<compile_context>
chip_gen: v7x
topology: tpu7x:2x2x1
jax: 0.10.0
libtpu: 0.0.40
codegen_flags: <defaults>
</compile_context>

<pallas_src>
import math
import functools

import jax
import jax.numpy as jnp
from jax import lax
from jax.experimental import pallas as pl
from jax.experimental.pallas import tpu as pltpu


# ----------------------------------------------------------------------------
# Fused kernel: conv(im2col matmul) + bias + ReLU + sine pos-encoding + add
# ----------------------------------------------------------------------------
def _fused_conv_pos_kernel(w_ref, b_ref, p_ref, o_ref, pe_ref, pe_sc,
                           *, H, W, npf, t_hw, eps, scale, ln_temp):
    C = 2 * npf
    hw_tile = pl.program_id(0)
    batch = pl.program_id(1)

    # ---- positional encoding for this HW tile (batch-invariant: compute once) ----
    @pl.when(batch == 0)
    def _():
        # channel-only quantities, shape (C, 1)
        c1 = lax.broadcasted_iota(jnp.int32, (C, 1), 0)
        cc1 = jnp.where(c1 < npf, c1, c1 - npf)               # index within y/x half
        ex = (2.0 * (cc1 >> 1).astype(jnp.float32)) * (1.0 / float(npf))
        inv_dim_t = jnp.exp(-ex * ln_temp)                     # 1 / dim_t   (C exp calls)
        phase = (cc1 & 1).astype(jnp.float32) * (math.pi / 2)  # cos(x) = sin(x + pi/2)
        is_y = c1 < npf                                        # first half = pos_y

        # spatial index for this tile, shape (C, t_hw)
        lane = lax.broadcasted_iota(jnp.int32, (C, t_hw), 1)
        p_idx = lane + hw_tile * t_hw
        if (W & (W - 1)) == 0:                                 # shift/mask, no div/mod
            hh = p_idx >> (W.bit_length() - 1)
            ww = p_idx & (W - 1)
        else:
            hh = p_idx // W
            ww = p_idx - hh * W

        y_n = (hh + 1).astype(jnp.float32) * (scale / (H + eps))
        x_n = (ww + 1).astype(jnp.float32) * (scale / (W + eps))
        arg = jnp.where(is_y, y_n, x_n) * inv_dim_t
        pe_sc[...] = jnp.sin(arg + phase)                      # single EUP op per element

    # ---- conv as matmul: (Cout, K) @ (K, t_hw) -> lane-dense (Cout, t_hw) ----
    acc = jnp.dot(w_ref[...], p_ref[0], preferred_element_type=jnp.float32)
    feats = jnp.maximum(acc + b_ref[...], 0.0)                 # bias + ReLU

    pe = pe_sc[...]
    pe_ref[0] = pe
    o_ref[0] = feats + pe


def _pick_hw_tile(HW, max_lanes=2048):
    """Full HW block when small; otherwise a 128-multiple tile (VMEM-safe on v7x)."""
    if HW <= max_lanes or HW % 128 != 0:
        return HW
    for t in range(max_lanes, 127, -128):
        if HW % t == 0:
            return t
    return HW


# ----------------------------------------------------------------------------
# Full JointIPPE forward
# ----------------------------------------------------------------------------
def joint_ippe_forward(x, conv_w, conv_b, *, temperature=10000.0, eps=1e-6):
    """x: (B, Cin, H, W) NCHW. conv_w: (Cout, Cin, 3, 3). conv_b: (Cout,).
    Returns (pos_backbone_features, pos_encoding), both (B, Cout, H*W)."""
    B, Cin, H, W = x.shape
    Cout = conv_w.shape[0]
    assert Cout % 2 == 0
    HW = H * W
    npf = Cout // 2

    # im2col glue (3x3, stride 1, pad 1), laid out directly as (B, K, HW) so no
    # post-matmul transpose is needed (K on sublanes, HW on lanes in the kernel).
    # TODO(synk): for production feature-map sizes, accumulate the 9 taps inside the
    #             kernel from a halo'd input block instead of materializing 9x patches.
    xp = jnp.pad(x, ((0, 0), (0, 0), (1, 1), (1, 1)))
    patches = jnp.stack(
        [xp[:, :, i:i + H, j:j + W] for i in range(3) for j in range(3)], axis=2
    ).reshape(B, Cin * 9, HW)                                  # (B, K, HW)

    w_mat = conv_w.reshape(Cout, Cin * 9)                      # (Cout, K)
    b_mat = conv_b.reshape(Cout, 1)                            # (Cout, 1)
    K = Cin * 9

    t_hw = _pick_hw_tile(HW)
    n_hw = HW // t_hw

    kernel = functools.partial(
        _fused_conv_pos_kernel,
        H=H, W=W, npf=npf, t_hw=t_hw, eps=eps,
        scale=2.0 * math.pi, ln_temp=math.log(temperature),
    )

    pos_feats, pos_enc = pl.pallas_call(
        kernel,
        out_shape=(
            jax.ShapeDtypeStruct((B, Cout, HW), jnp.float32),
            jax.ShapeDtypeStruct((B, Cout, HW), jnp.float32),
        ),
        grid_spec=pltpu.PrefetchScalarGridSpec(
            num_scalar_prefetch=0,
            grid=(n_hw, B),                                    # batch innermost -> PE reuse
            in_specs=[
                pl.BlockSpec((Cout, K), lambda t, b: (0, 0)),        # weights (resident)
                pl.BlockSpec((Cout, 1), lambda t, b: (0, 0)),        # bias    (resident)
                pl.BlockSpec((1, K, t_hw), lambda t, b: (b, 0, t)),  # patches tile
            ],
            out_specs=(
                pl.BlockSpec((1, Cout, t_hw), lambda t, b: (b, 0, t)),
                pl.BlockSpec((1, Cout, t_hw), lambda t, b: (b, 0, t)),
            ),
            scratch_shapes=[pltpu.VMEM((Cout, t_hw), jnp.float32)],  # cached pos-encoding
        ),
        compiler_params=pltpu.CompilerParams(
            dimension_semantics=("arbitrary", "arbitrary"),    # scratch carried over batch
        ),
    )(w_mat, b_mat, patches)
    return pos_feats, pos_enc


# ----------------------------------------------------------------------------
# Pure-JAX reference (mirrors the PyTorch module semantics)
# ----------------------------------------------------------------------------
def _reference(x, conv_w, conv_b, temperature=10000.0, eps=1e-6):
    B, Cin, H, W = x.shape
    Cout = conv_w.shape[0]
    feats = lax.conv_general_dilated(
        x, conv_w, window_strides=(1, 1), padding="SAME",
        dimension_numbers=("NCHW", "OIHW", "NCHW"),
    ) + conv_b[None, :, None, None]
    feats = jnp.maximum(feats, 0.0)                            # (B, Cout, H, W)

    npf = Cout // 2
    scale = 2.0 * math.pi
    ones = jnp.ones((B, H, W), jnp.float32)
    y_embed = jnp.cumsum(ones, axis=1)
    x_embed = jnp.cumsum(ones, axis=2)
    y_embed = y_embed / (y_embed[:, -1:, :] + eps) * scale
    x_embed = x_embed / (x_embed[:, :, -1:] + eps) * scale
    dim_t = temperature ** (2.0 * (jnp.arange(npf) // 2).astype(jnp.float32) / npf)
    pos_x = x_embed[..., None] / dim_t
    pos_y = y_embed[..., None] / dim_t
    pos_x = jnp.stack((jnp.sin(pos_x[..., 0::2]), jnp.cos(pos_x[..., 1::2])),
                      axis=4).reshape(B, H, W, npf)
    pos_y = jnp.stack((jnp.sin(pos_y[..., 0::2]), jnp.cos(pos_y[..., 1::2])),
                      axis=4).reshape(B, H, W, npf)
    pos = jnp.concatenate((pos_y, pos_x), axis=3).transpose(0, 3, 1, 2)  # (B, Cout, H, W)

    pos_feats = feats + pos
    return pos_feats.reshape(B, Cout, H * W), pos.reshape(B, Cout, H * W)


if __name__ == "__main__":
    B, Cin, H, W = 2, 4, 16, 16
    Cout = 32

    key = jax.random.PRNGKey(0)
    kx, kw, kb = jax.random.split(key, 3)
    x = jax.random.normal(kx, (B, Cin, H, W), jnp.float32)
    conv_w = jax.random.normal(kw, (Cout, Cin, 3, 3), jnp.float32) * 0.1
    conv_b = jax.random.normal(kb, (Cout,), jnp.float32) * 0.01

    pos_feats, pos_enc = jax.jit(joint_ippe_forward)(x, conv_w, conv_b)
    jax.block_until_ready((pos_feats, pos_enc))

    ref_feats, ref_enc = _reference(x, conv_w, conv_b)
    assert pos_feats.shape == (B, Cout, H * W) and pos_enc.shape == (B, Cout, H * W)
    assert jnp.allclose(pos_feats, ref_feats, atol=2e-3, rtol=2e-3)
    assert jnp.allclose(pos_enc, ref_enc, atol=2e-3, rtol=2e-3)

    print("KERNEL_OK")
</pallas_src>

<mosaic_0001>
module attributes {stable_mosaic.version = 11 : i64} {
  func.func @_fused_conv_pos_kernel(%arg0: i32, %arg1: i32, %arg2: memref<32x36xf32, #tpu.memory_space<vmem>>, %arg3: memref<32x1xf32, #tpu.memory_space<vmem>>, %arg4: memref<1x36x256xf32, #tpu.memory_space<vmem>>, %arg5: memref<1x32x256xf32, #tpu.memory_space<vmem>>, %arg6: memref<1x32x256xf32, #tpu.memory_space<vmem>>, %arg7: memref<32x256xf32, #tpu.memory_space<vmem>>) attributes {dimension_semantics = [#tpu.dimension_semantics<arbitrary>, #tpu.dimension_semantics<arbitrary>], iteration_bounds = array<i64: 1, 2>, scalar_prefetch = 0 : i64, scratch_operands = 1 : i64, tpu.core_type = #tpu.core_type<tc>, window_params = [{pipeline_mode = #tpu.pipeline_mode<synchronous>, transform_indices = @transform_0, window_bounds = array<i64: 32, 36>}, {pipeline_mode = #tpu.pipeline_mode<synchronous>, transform_indices = @transform_1, window_bounds = array<i64: 32, 1>}, {transform_indices = @transform_2, window_bounds = array<i64: 1, 36, 256>}, {transform_indices = @transform_3, window_bounds = array<i64: 1, 32, 256>}, {transform_indices = @transform_4, window_bounds = array<i64: 1, 32, 256>}]} {
    %c0_i32 = arith.constant 0 : i32
    %0 = arith.cmpi eq, %arg1, %c0_i32 : i32
    %1 = arith.extui %0 : i1 to i32
    %c0_i32_0 = arith.constant 0 : i32
    %2 = arith.cmpi ne, %1, %c0_i32_0 : i32
    scf.if %2 {
      %20 = tpu.iota {dimensions = array<i32: 0>} : vector<32x1xi32>
      %c16_i32 = arith.constant 16 : i32
      %21 = vector.broadcast %c16_i32 : i32 to vector<32x1xi32>
      %22 = arith.cmpi slt, %20, %21 : vector<32x1xi32>
      %c16_i32_16 = arith.constant 16 : i32
      %23 = vector.broadcast %c16_i32_16 : i32 to vector<32x1xi32>
      %24 = arith.subi %20, %23 : vector<32x1xi32>
      %25 = arith.select %22, %20, %24 : vector<32x1xi1>, vector<32x1xi32>
      %c1_i32 = arith.constant 1 : i32
      %26 = vector.broadcast %c1_i32 : i32 to vector<32x1xi32>
      %27 = arith.shrsi %25, %26 : vector<32x1xi32>
      %28 = arith.sitofp %27 : vector<32x1xi32> to vector<32x1xf32>
      %cst_17 = arith.constant 2.000000e+00 : f32
      %29 = vector.broadcast %cst_17 : f32 to vector<32x1xf32>
      %30 = arith.mulf %29, %28 : vector<32x1xf32>
      %cst_18 = arith.constant 6.250000e-02 : f32
      %31 = vector.broadcast %cst_18 : f32 to vector<32x1xf32>
      %32 = arith.mulf %30, %31 : vector<32x1xf32>
      %cst_19 = arith.constant 0.000000e+00 : f32
      %33 = vector.broadcast %cst_19 : f32 to vector<32x1xf32>
      %34 = arith.subf %33, %32 : vector<32x1xf32>
      %cst_20 = arith.constant 9.21034049 : f32
      %35 = vector.broadcast %cst_20 : f32 to vector<32x1xf32>
      %36 = arith.mulf %34, %35 : vector<32x1xf32>
      %37 = math.exp %36 : vector<32x1xf32>
      %c1_i32_21 = arith.constant 1 : i32
      %38 = vector.broadcast %c1_i32_21 : i32 to vector<32x1xi32>
      %39 = arith.andi %25, %38 : vector<32x1xi32>
      %40 = arith.sitofp %39 : vector<32x1xi32> to vector<32x1xf32>
      %cst_22 = arith.constant 1.57079637 : f32
      %41 = vector.broadcast %cst_22 : f32 to vector<32x1xf32>
      %42 = arith.mulf %40, %41 : vector<32x1xf32>
      %c16_i32_23 = arith.constant 16 : i32
      %43 = vector.broadcast %c16_i32_23 : i32 to vector<32x1xi32>
      %44 = arith.cmpi slt, %20, %43 : vector<32x1xi32>
      %45 = tpu.iota {dimensions = array<i32: 1>} : vector<32x256xi32>
      %c256_i32 = arith.constant 256 : i32
      %46 = arith.muli %arg0, %c256_i32 : i32
      %47 = vector.broadcast %46 : i32 to vector<32x256xi32>
      %48 = arith.addi %45, %47 : vector<32x256xi32>
      %c4_i32 = arith.constant 4 : i32
      %49 = vector.broadcast %c4_i32 : i32 to vector<32x256xi32>
      %50 = arith.shrsi %48, %49 : vector<32x256xi32>
      %c15_i32 = arith.constant 15 : i32
      %51 = vector.broadcast %c15_i32 : i32 to vector<32x256xi32>
      %52 = arith.andi %48, %51 : vector<32x256xi32>
      %c1_i32_24 = arith.constant 1 : i32
      %53 = vector.broadcast %c1_i32_24 : i32 to vector<32x256xi32>
      %54 = arith.addi %50, %53 : vector<32x256xi32>
      %55 = arith.sitofp %54 : vector<32x256xi32> to vector<32x256xf32>
      %cst_25 = arith.constant 0.392699063 : f32
      %56 = vector.broadcast %cst_25 : f32 to vector<32x256xf32>
      %57 = arith.mulf %55, %56 : vector<32x256xf32>
      %c1_i32_26 = arith.constant 1 : i32
      %58 = vector.broadcast %c1_i32_26 : i32 to vector<32x256xi32>
      %59 = arith.addi %52, %58 : vector<32x256xi32>
      %60 = arith.sitofp %59 : vector<32x256xi32> to vector<32x256xf32>
      %cst_27 = arith.constant 0.392699063 : f32
      %61 = vector.broadcast %cst_27 : f32 to vector<32x256xf32>
      %62 = arith.mulf %60, %61 : vector<32x256xf32>
      %63 = vector.shape_cast %44 : vector<32x1xi1> to vector<32x1xi1>
      %64 = vector.broadcast %63 : vector<32x1xi1> to vector<32x256xi1>
      %65 = arith.select %64, %57, %62 : vector<32x256xi1>, vector<32x256xf32>
      %66 = vector.broadcast %37 : vector<32x1xf32> to vector<32x256xf32>
      %67 = arith.mulf %65, %66 : vector<32x256xf32>
      %68 = vector.broadcast %42 : vector<32x1xf32> to vector<32x256xf32>
      %69 = arith.addf %67, %68 : vector<32x256xf32>
      %70 = math.sin %69 : vector<32x256xf32>
      %c0_28 = arith.constant 0 : index
      %c0_29 = arith.constant 0 : index
      %71 = vector.load %arg7[%c0_28, %c0_29] : memref<32x256xf32, #tpu.memory_space<vmem>>, vector<32x256xf32>
      tpu.vector_store %arg7[%c0_28, %c0_29], %70 {strides = array<i32>} : memref<32x256xf32, #tpu.memory_space<vmem>>, vector<32x256xf32>,
    } else {
    }
    %c0 = arith.constant 0 : index
    %c0_1 = arith.constant 0 : index
    %3 = vector.load %arg2[%c0, %c0_1] : memref<32x36xf32, #tpu.memory_space<vmem>>, vector<32x36xf32>
    %c0_2 = arith.constant 0 : index
    %c0_3 = arith.constant 0 : index
    %c0_4 = arith.constant 0 : index
    %4 = vector.load %arg4[%c0_2, %c0_3, %c0_4] : memref<1x36x256xf32, #tpu.memory_space<vmem>>, vector<1x36x256xf32>
    %5 = vector.shape_cast %4 : vector<1x36x256xf32> to vector<36x256xf32>
    %cst = arith.constant dense<0.000000e+00> : vector<32x256xf32>
    %6 = tpu.matmul %3, %5, %cst {dimension_numbers = #tpu.dot_dimension_numbers<[1], [0], [0], [1], [0, 0, 1, 1], [], []>} : vector<32x36xf32>, vector<36x256xf32>, vector<32x256xf32> -> vector<32x256xf32>
    %c0_5 = arith.constant 0 : index
    %c0_6 = arith.constant 0 : index
    %7 = vector.load %arg3[%c0_5, %c0_6] : memref<32x1xf32, #tpu.memory_space<vmem>>, vector<32x1xf32>
    %8 = vector.broadcast %7 : vector<32x1xf32> to vector<32x256xf32>
    %9 = arith.addf %6, %8 : vector<32x256xf32>
    %cst_7 = arith.constant 0.000000e+00 : f32
    %10 = vector.broadcast %cst_7 : f32 to vector<32x256xf32>
    %11 = arith.maximumf %9, %10 : vector<32x256xf32>
    %c0_8 = arith.constant 0 : index
    %c0_9 = arith.constant 0 : index
    %12 = vector.load %arg7[%c0_8, %c0_9] : memref<32x256xf32, #tpu.memory_space<vmem>>, vector<32x256xf32>
    %c0_10 = arith.constant 0 : index
    %c0_11 = arith.constant 0 : index
    %c0_12 = arith.constant 0 : index
    %13 = vector.load %arg6[%c0_10, %c0_11, %c0_12] : memref<1x32x256xf32, #tpu.memory_space<vmem>>, vector<1x32x256xf32>
    %14 = vector.shape_cast %13 : vector<1x32x256xf32> to vector<32x256xf32>
    %15 = vector.shape_cast %12 : vector<32x256xf32> to vector<1x32x256xf32>
    tpu.vector_store %arg6[%c0_10, %c0_11, %c0_12], %15 {strides = array<i32>} : memref<1x32x256xf32, #tpu.memory_space<vmem>>, vector<1x32x256xf32>,
    %16 = arith.addf %11, %12 : vector<32x256xf32>
    %c0_13 = arith.constant 0 : index
    %c0_14 = arith.constant 0 : index
    %c0_15 = arith.constant 0 : index
    %17 = vector.load %arg5[%c0_13, %c0_14, %c0_15] : memref<1x32x256xf32, #tpu.memory_space<vmem>>, vector<1x32x256xf32>
    %18 = vector.shape_cast %17 : vector<1x32x256xf32> to vector<32x256xf32>
    %19 = vector.shape_cast %16 : vector<32x256xf32> to vector<1x32x256xf32>
    tpu.vector_store %arg5[%c0_13, %c0_14, %c0_15], %19 {strides = array<i32>} : memref<1x32x256xf32, #tpu.memory_space<vmem>>, vector<1x32x256xf32>,
    return
  }
  func.func @transform_0(%arg0: i32, %arg1: i32) -> (i32, i32) {
    %c0_i32 = arith.constant 0 : i32
    %c0_i32_0 = arith.constant 0 : i32
    %c0_i32_1 = arith.constant 0 : i32
    return %c0_i32, %c0_i32_0 : i32, i32
  }
  func.func @transform_1(%arg0: i32, %arg1: i32) -> (i32, i32) {
    %c0_i32 = arith.constant 0 : i32
    %c0_i32_0 = arith.constant 0 : i32
    %c0_i32_1 = arith.constant 0 : i32
    return %c0_i32, %c0_i32_0 : i32, i32
  }
  func.func @transform_2(%arg0: i32, %arg1: i32) -> (i32, i32, i32) {
    %c0_i32 = arith.constant 0 : i32
    %c0_i32_0 = arith.constant 0 : i32
    return %arg1, %c0_i32, %arg0 : i32, i32, i32
  }
  func.func @transform_3(%arg0: i32, %arg1: i32) -> (i32, i32, i32) {
    %c0_i32 = arith.constant 0 : i32
    %c0_i32_0 = arith.constant 0 : i32
    return %arg1, %c0_i32, %arg0 : i32, i32, i32
  }
  func.func @transform_4(%arg0: i32, %arg1: i32) -> (i32, i32, i32) {
    %c0_i32 = arith.constant 0 : i32
    %c0_i32_0 = arith.constant 0 : i32
    return %arg1, %c0_i32, %arg0 : i32, i32, i32
  }
}

</mosaic_0001>

<bundles_post_ra>
// kernel: joint_ippe_forward.1
= control target key start
LH: loop header
LB: loop body
LE: loop exit
PB: predicated region body
PF: predicated region fallthrough
CT: control target
= control target key end

     0   :  { %10 = vsyncpa [#allocation4], 0  ;;  %s2740_s0 = inlined_call_operand.vmem [shape: f32[32,36], index: 0, kind: input, shape index: {}]   ;;  %s2741_s1 = inlined_call_operand.vmem [shape: f32[32,1], index: 1, kind: input, shape index: {}]   ;;  %s2742_s2 = inlined_call_operand.vmem [shape: f32[2,36,256], index: 2, kind: input, shape index: {}]   ;;  %s2743_s3 = inlined_call_operand.hbm [shape: f32[2,32,256], index: 3, kind: output, shape index: {0}]   ;;  %s2744_s4 = inlined_call_operand.hbm [shape: f32[2,32,256], index: 4, kind: output, shape index: {1}]  }
   0x1   :  { %12 = vsyncpa [#allocation4 + $0x1], 0 }
   0x2   :  { %13 = vsyncpa [#allocation6], 0 }
   0x3   :  { %15 = vsyncpa [#allocation6 + $0x1], 0  ;;  %s1906_s15 = smov 0   ;;  %s1908_s16 = smov 0  }
   0x4   :  { %s1910_s17 = smov 0   ;;  %s1912_s18 = smov 0  }
   0x5   :  { %s1914_s19 = smov 0   ;;  %s1916_s20 = smov 0  }
   0x6 LB: > { %s1540_s21 = sadd.s32 4294967295, %s1867_s20   ;;  %s1541_s22 = sadd.s32 4294967294, %s1867_s20   ;;  %s1867_s20 = sphi %s1916_s20, %s21_s20   ;;  %s1863_s19 = sphi %s1914_s19, %s2763_s19   ;;  %s1859_s18 = sphi %s1912_s18, %s2762_s18   ;;  %s1855_s17 = sphi %s1910_s17, %s2761_s17   ;;  %s1851_s16 = sphi %s1908_s16, %s2760_s16   ;;  %s1847_s15 = sphi %s1906_s15, %s2759_s15  }
   0x7   : > { %s30_s23 = sadd.s32 1, %s1863_s19  ;;  %s112_s24 = sadd.s32 1, %s1855_s17 }
   0x8   : > { %p31_p0 = scmp.ge.s32.totalorder %s30_s23, 2  ;;  %p122_p1 = scmp.ne.s32.totalorder %s1855_s17, %s1851_s16 }
   0x9   : > { %p123_p2 = scmp.eq.s32.totalorder %s1540_s21, 1  ;;  %p128_p3 = scmp.ne.s32.totalorder %s1851_s16, %s1847_s15 }
   0xa   : > { %s2765_s23 = smov (%p31_p0, %s30_s23), 0  ;;  %p129_p5 = scmp.eq.s32.totalorder %s1541_s22, 1 }
   0xb   : > { %p1946_p4 = por %p123_p2, %p122_p1  ;;  %s107_s26 = ssub.s32 %s1863_s19, %s2765_s23 }
   0xc   : > { %p1544_p6 = scmp.ge.s32.totalorder %s1867_s20, 1  ;;  %p110_p7 = scmp.eq.s32.totalorder %s107_s26, 0 }
   0xd   : > { %p1953_p8 = por %p129_p5, %p128_p3  ;;  %p194_p9 = scmp.lt.s32.totalorder %s1867_s20, 3 }
   0xe   : > { %s1959_s28 = scalar_select %p110_p7, %s1855_s17, %s112_s24  }
   0xf   : > { %p195_p10 = pnand %p1544_p6, %p194_p9 }
  0x10   : > { %s1962_s29 = sand.u32 (!%p195_p10), 1, %s1851_s16   ;;  %p230_p11 = scmp.lt.s32.totalorder (!%p195_p10), %s1859_s18, 1 }
  0x11   : > { %198 = sbr.rel (%p195_p10) target bundleno = 544 (0x220), region = 32  ;;  %s1545_s30 = sshll.u32 (!%p195_p10), %s1962_s29, 6 }
  0x12   : > { %s1972_s10 = scalar_lea.vmem (!%p195_p10), [#allocation3], %s1545_s30  ;;  %s1974_s11 = scalar_lea.vmem (!%p195_p10), [#allocation5], %s1545_s30 }
  0x13   : > { %p1548_p12 = scmp.ne.s32.totalorder (!%p195_p10), %s1859_s18, 0 }
  0x18   : > { %s231_s5 = scalar_select %p230_p11, %s1859_s18, 1 }
  0x19   : > { %244 = sbr.rel (%p1548_p12) target bundleno = 294 (0x126), region = 36  ;;  %v245_v0 = vlaneseq (!%p1548_p12) }
  0x1a   : > { %s1614_s6 = smul.u32 80, %s231_s5 }
  0x1b   : > { %v246_v1 = vshrl.u32 (!%p1548_p12), %v245_v0, 7  ;;  %v306_v5 = vand.u32 (!%p1548_p12), 127, %v245_v0 }
  0x1c   : > { %s1970_s9 = scalar_lea.vmem %s2742_s2, %s1614_s6 }
  0x1d   : > { %v247_v2 = vadd.s32 (!%p1548_p12), 8, %v246_v1  ;;  %v249_v3 = vadd.s32 (!%p1548_p12), 24, %v246_v1  ;;  %v261_v4 = vshra.s32 (!%p1548_p12), %v246_v1, 1  ;;  %v307_v12 = vadd.s32 (!%p1548_p12), 128, %v306_v5 }
  0x1e   : > { %v312_v19 = vshra.s32 (!%p1548_p12), %v306_v5, 4  ;;  %v314_v21 = vand.u32 (!%p1548_p12), 15, %v306_v5  ;;  %v293_v35 = vand.u32 (!%p1548_p12), 1, %v246_v1 }
  0x1f   : > { %v1551_v6 = vadd.s32 (!%p1548_p12), 4294967280, %v249_v3  ;;  %v262_v7 = vshra.s32 (!%p1548_p12), %v247_v2, 1  ;;  %v265_v8 = vcvt.s32.f32 (!%p1548_p12), %v261_v4  ;;  %v313_v20 = vshra.s32 (!%p1548_p12), %v307_v12, 4 }
  0x20   : > { %v315_v22 = vand.u32 15, %v307_v12  ;;  %v316_v29 = vadd.s32 1, %v312_v19  ;;  %v322_v31 = vadd.s32 1, %v314_v21  ;;  %v294_v41 = vand.u32 1, %v247_v2 }
  0x21   : > { %v264_v9 = vshra.s32 %v1551_v6, 1  ;;  %v266_v10 = vcvt.s32.f32 %v262_v7  ;;  %v269_v11 = vmul.f32 2.0, %v265_v8  ;;  %v317_v30 = vadd.s32 1, %v313_v20 }
  0x22   : > { %v323_v32 = vadd.s32 1, %v315_v22  ;;  %v318_v37 = vcvt.s32.f32 %v316_v29  ;;  %v324_v39 = vcvt.s32.f32 %v322_v31  ;;  %v296_v42 = vand.u32 1, %v1551_v6 }
  0x23   : > { %v268_v13 = vcvt.s32.f32 %v264_v9  ;;  %v270_v14 = vmul.f32 2.0, %v266_v10  ;;  %v273_v15 = vmul.f32 0.0625, %v269_v11  ;;  %v319_v38 = vcvt.s32.f32 %v317_v30 }
  0x24   : > { %v325_v40 = vcvt.s32.f32 %v323_v32  ;;  %v297_v43 = vcvt.s32.f32 %v293_v35  ;;  %v320_v44 = vmul.f32 0.39269906, %v318_v37  ;;  %v326_v46 = vmul.f32 0.39269906, %v324_v39 }
  0x25   : > { %v272_v16 = vmul.f32 2.0, %v268_v13  ;;  %v274_v17 = vmul.f32 0.0625, %v270_v14  ;;  %v277_v18 = vsub.f32 0.0, %v273_v15  ;;  %v1977_v45 = vmul.f32 0.39269906, %v319_v38 }
  0x26   : > { %v327_v47 = vmul.f32 0.39269906, %v325_v40  ;;  %v298_v48 = vcvt.s32.f32 %v294_v41  ;;  %v300_v49 = vcvt.s32.f32 %v296_v42  ;;  %v301_v50 = vmul.f32 1.5707964, %v297_v43 }
  0x27   : > { %v276_v23 = vmul.f32 0.0625, %v272_v16  ;;  %v278_v24 = vsub.f32 0.0, %v274_v17  ;;  %v281_v25 = vmul.f32 9.2103405, %v277_v18  ;;  %v1869_v31 = vmov 683565275  }
  0x28   : > { %v1982_v57 = vmul.f32 1.5707964, %v298_v48  ;;  %v304_v58 = vmul.f32 1.5707964, %v300_v49  ;;  %v1871_v35 = vmov 2131351028  }
  0x29   : > { %v280_v26 = vsub.f32 0.0, %v276_v23  ;;  %v282_v27 = vmul.f32 9.2103405, %v278_v24  ;;  %v285_v28 = vmul.f32 1.442695, %v281_v25 }
  0x2a   : > { %v1872_v37 = vmov 2102212464   ;;  %v1873_v39 = vmov 920167782   ;;  %v1874_v48 = vmov 1326507024  }
  0x2b   : > { %v284_v33 = vmul.f32 9.2103405, %v280_v26  ;;  %1717 = vpow2.f32 %v285_v28  ;;  %v287_v34 = vmul.f32 1.442695, %v282_v27 }
  0x2d   : > { %1719 = vpow2.f32 %v287_v34  ;;  %v291_v36 = vmul.f32 1.442695, %v284_v33  ;;  %v1870_v33 = vmov 2475754826  }
  0x2f   : > { %1721 = vpow2.f32 %v291_v36 }
  0x35   : > { %v1718_v51 = vpop.eup %1717 }
  0x36   : > { %v344_v52 = vmul.f32 %v1718_v51, %v320_v44  ;;  %v345_v53 = vmul.f32 %v1718_v51, %v1977_v45  ;;  %v348_v54 = vmul.f32 %v1718_v51, %v326_v46  ;;  %v349_v55 = vmul.f32 %v1718_v51, %v327_v47 }
  0x37   : > { %v1980_v56 = vpop.eup %1719 }
  0x38   : > { %v346_v59 = vmul.f32 %v1980_v56, %v320_v44  ;;  %v1985_v60 = vadd.f32 %v344_v52, %v301_v50  ;;  %v1987_v62 = vadd.f32 %v345_v53, %v301_v50  ;;  %v1989_v63 = vadd.f32 %v348_v54, %v301_v50 }
  0x39   : > { %v1722_v61 = vpop.eup %1721  ;;  %v1991_v0 = vadd.f32 %v349_v55, %v301_v50 }
  0x3a   : > { %v350_v1 = vmul.f32 %v1722_v61, %v326_v46  ;;  %v351_v2 = vmul.f32 %v1722_v61, %v327_v47  ;;  %v360_v3 = vand.u32 2147483647, %v1985_v60  ;;  %v363_v4 = vand.u32 2139095040, %v1985_v60 }
  0x3b   : > { %v1996_v5 = vadd.f32 %v346_v59, %v1982_v57  ;;  %v464_v8 = vand.u32 2147483647, %v1987_v62  ;;  %v467_v10 = vand.u32 2139095040, %v1987_v62  ;;  %vm362_vm13 = vcmp.lt.s32.totalorder %v1985_v60, 0 }
  0x3c   : > { %v1998_v6 = vadd.f32 %v350_v1, %v304_v58  ;;  %v2000_v7 = vadd.f32 %v351_v2, %v304_v58  ;;  %v364_v9 = vshrl.u32 %v363_v4, 23  ;;  %v367_v11 = vand.u32 8388607, %v360_v3 }
  0x3d   : > { %v471_v12 = vand.u32 8388607, %v464_v8  ;;  %v468_v14 = vshrl.u32 %v467_v10, 23  ;;  %v571_v15 = vand.u32 2139095040, %v1996_v5  ;;  %v568_v29 = vand.u32 2147483647, %v1996_v5 }
  0x3e   : > { %v1552_v13 = vadd.s32 4294967169, %v364_v9  ;;  %v368_v18 = vor.u32 8388608, %v367_v11  ;;  %vm2123_vm15 = vcmp.le.f32.partialorder %v360_v3, 0.7853982 }
  0x3f   : > { %v1556_v17 = vadd.s32 4294967169, %v468_v14  ;;  %v472_v19 = vor.u32 8388608, %v471_v12  ;;  %v572_v20 = vshrl.u32 %v571_v15, 23 }
  0x40   : > { %v370_v16 = vadd.s32 1, %v1552_v13  ;;  %v2009_v26 = vshll.u32 %v368_v18, 8 }
  0x41   : > { %v474_v21 = vadd.s32 1, %v1556_v17  ;;  %v1560_v23 = vadd.s32 4294967169, %v572_v20  ;;  %v2011_v28 = vshll.u32 %v472_v19, 8 }
  0x42   : > { %vm371_vm0 = vcmp.gt.s32.totalorder %v370_v16, 0 }
  0x43   : > { %v372_v22 = vsel %vm371_vm0, %v370_v16, 0  ;;  %vm475_vm1 = vcmp.gt.s32.totalorder %v474_v21, 0  ;;  %v2019_v41 = vadd.s32 1, %v1560_v23 }
  0x44   : > { %v373_v24 = vshrl.u32 %v372_v22, 5  ;;  %v374_v25 = vand.u32 31, %v372_v22  ;;  %v476_v27 = vsel %vm475_vm1, %v474_v21, 0 }
  0x45   : > { %v477_v55 = vshrl.u32 %v476_v27, 5  ;;  %v478_v58 = vand.u32 31, %v476_v27  ;;  %vm579_vm8 = vcmp.gt.s32.totalorder %v2019_v41, 0 }
  0x46   : > { %v375_v30 = vsub.s32 32, %v374_v25  ;;  %v377_v32 = vshll.u32 %v1869_v31, %v374_v25  ;;  %v380_v34 = vshll.u32 %v1870_v33, %v374_v25  ;;  %v383_v36 = vshll.u32 %v1871_v35, %v374_v25 }
  0x47   : > { %v386_v38 = vshll.u32 %v1872_v37, %v374_v25  ;;  %v389_v40 = vshll.u32 %v1873_v39, %v374_v25  ;;  %vm392_vm2 = vcmp.lt.s32.totalorder %v373_v24, 1  ;;  %vm393_vm3 = vcmp.lt.s32.totalorder %v373_v24, 2 }
  0x48   : > { %v376_v42 = vshrl.u32 %v1869_v31, %v375_v30  ;;  %v378_v43 = vshrl.u32 %v1870_v33, %v375_v30  ;;  %v381_v44 = vshrl.u32 %v1871_v35, %v375_v30  ;;  %v384_v46 = vshrl.u32 %v1872_v37, %v375_v30 }
  0x49   : > { %v387_v47 = vshrl.u32 %v1873_v39, %v375_v30  ;;  %v390_v49 = vshrl.u32 %v1874_v48, %v375_v30  ;;  %vm394_vm4 = vcmp.lt.s32.totalorder %v373_v24, 3  ;;  %vm395_vm5 = vcmp.lt.s32.totalorder %v373_v24, 4 }
  0x4a   : > { %v379_v50 = vor.u32 %v378_v43, %v377_v32  ;;  %v382_v51 = vor.u32 %v381_v44, %v380_v34  ;;  %v385_v52 = vor.u32 %v384_v46, %v383_v36  ;;  %v479_v11 = vsub.s32 32, %v478_v58 }
  0x4b   : > { %v388_v53 = vor.u32 %v387_v47, %v386_v38  ;;  %v391_v54 = vor.u32 %v390_v49, %v389_v40  ;;  %v481_v15 = vshll.u32 %v1869_v31, %v478_v58  ;;  %v484_v27 = vshll.u32 %v1870_v33, %v478_v58 }
  0x4c   : > { %v396_v59 = vsel %vm392_vm2, %v376_v42, %v379_v50  ;;  %v397_v61 = vsel %vm395_vm5, %v385_v52, 2102212464  ;;  %v400_v1 = vsel %vm392_vm2, %v379_v50, %v382_v51  ;;  %v404_v2 = vsel %vm392_vm2, %v382_v51, %v385_v52 }
  0x4d   : > { %v398_v4 = vsel %vm394_vm4, %v382_v51, %v397_v61  ;;  %v401_v9 = vsel %vm395_vm5, %v388_v53, 920167782  ;;  %v405_v10 = vsel %vm395_vm5, %v391_v54, 1326507024  ;;  %v480_v19 = vshrl.u32 %v1869_v31, %v479_v11 }
  0x4e   : > { %v399_v12 = vsel %vm393_vm3, %v396_v59, %v398_v4  ;;  %v402_v13 = vsel %vm394_vm4, %v385_v52, %v401_v9  ;;  %v406_v14 = vsel %vm394_vm4, %v388_v53, %v405_v10  ;;  %v482_v25 = vshrl.u32 %v1870_v33, %v479_v11 }
  0x4f   : > { %v403_v16 = vsel %vm393_vm3, %v400_v1, %v402_v13  ;;  %v407_v17 = vsel %vm393_vm3, %v404_v2, %v406_v14  ;;  %v415_v18 = vmul.u32 %v2009_v26, %v399_v12  ;;  %v485_v24 = vshrl.u32 %v1871_v35, %v479_v11 }
  0x50   : > { %v2040_v20 = vmul.u32.u64.low %v2009_v26, %v407_v17  ;;  %v2041_v21 = vmul.u32.u64.high %v2009_v26, %v407_v17, %v2040_v20  ;;  %v2044_v22 = vmul.u32.u64.low %v2009_v26, %v403_v16  ;;  %v2045_v23 = vmul.u32.u64.high %v2009_v26, %v403_v16, %v2044_v22 }
  0x51   : > { %v487_v30 = vshll.u32 %v1871_v35, %v478_v58  ;;  %v488_v32 = vshrl.u32 %v1872_v37, %v479_v11  ;;  %v490_v34 = vshll.u32 %v1872_v37, %v478_v58  ;;  %v491_v36 = vshrl.u32 %v1873_v39, %v479_v11 }
  0x52   : > { %v493_v38 = vshll.u32 %v1873_v39, %v478_v58  ;;  %v483_v40 = vor.u32 %v482_v25, %v481_v15  ;;  %v486_v26 = vor.u32 %v485_v24, %v484_v27  ;;  %v494_v42 = vshrl.u32 %v1874_v48, %v479_v11 }
  0x53   : > { %vm496_vm6 = vcmp.lt.s32.totalorder %v477_v55, 1  ;;  %vm417_vm7 = vc.u32 %v2041_v21, %v2044_v22  ;;  %v418_v43 = vadd.s32 1, %v2045_v23  ;;  %v489_v44 = vor.u32 %v488_v32, %v487_v30 }
  0x54   : > { %v492_v46 = vor.u32 %v491_v36, %v490_v34  ;;  %v495_v47 = vor.u32 %v494_v42, %v493_v38  ;;  %vm497_vm9 = vcmp.lt.s32.totalorder %v477_v55, 2  ;;  %vm498_vm10 = vcmp.lt.s32.totalorder %v477_v55, 3 }
  0x55   : > { %v419_v49 = vsel %vm417_vm7, %v418_v43, %v2045_v23  ;;  %vm499_vm11 = vcmp.lt.s32.totalorder %v477_v55, 4  ;;  %v500_v50 = vsel %vm496_vm6, %v480_v19, %v483_v40  ;;  %v504_v51 = vsel %vm496_vm6, %v483_v40, %v486_v26 }
  0x56   : > { %v420_v52 = vadd.s32 %v419_v49, %v415_v18  ;;  %v501_v53 = vsel %vm499_vm11, %v489_v44, 2102212464  ;;  %v505_v54 = vsel %vm499_vm11, %v492_v46, 920167782  ;;  %v508_v58 = vsel %vm496_vm6, %v486_v26, %v489_v44 }
  0x57   : > { %v347_v59 = vmul.f32 %v1980_v56, %v1977_v45  ;;  %v502_v61 = vsel %vm498_vm10, %v486_v26, %v501_v53  ;;  %v506_v1 = vsel %vm498_vm10, %v489_v44, %v505_v54  ;;  %v509_v2 = vsel %vm499_vm11, %v495_v47, 1326507024 }
  0x58   : > { %v421_v4 = vadd.s32 536870912, %v420_v52  ;;  %v507_v9 = vsel %vm497_vm9, %v504_v51, %v506_v1  ;;  %v510_v10 = vsel %vm498_vm10, %v492_v46, %v509_v2  ;;  %v580_v11 = vsel %vm579_vm8, %v2019_v41, 0 }
  0x59   : > { %v503_v12 = vsel %vm497_vm9, %v500_v50, %v502_v61  ;;  %v511_v13 = vsel %vm497_vm9, %v508_v58, %v510_v10  ;;  %v2074_v14 = vmul.u32.u64.low %v2011_v28, %v507_v9  ;;  %v2075_v15 = vmul.u32.u64.high %v2011_v28, %v507_v9, %v2074_v14 }
  0x5a   : > { %v2078_v45 = vshrl.u32 %v421_v4, 30  ;;  %v2081_v56 = vmul.u32.u64.low %v2011_v28, %v511_v13  ;;  %v2082_v16 = vmul.u32.u64.high %v2011_v28, %v511_v13, %v2081_v56  ;;  %v575_v17 = vand.u32 8388607, %v568_v29 }
  0x5b   : > { %v2087_v41 = vadd.f32 %v347_v59, %v1982_v57  ;;  %v582_v18 = vand.u32 31, %v580_v11  ;;  %v519_v19 = vmul.u32 %v2011_v28, %v503_v12  ;;  %v522_v20 = vadd.s32 1, %v2075_v15 }
  0x5c   : > { %v423_v55 = vshll.u32 %v2078_v45, 30  ;;  %vm521_vm12 = vc.u32 %v2082_v16, %v2074_v14  ;;  %v576_v27 = vor.u32 8388608, %v575_v17  ;;  %v2103_v40 = vshrl.u32 %v580_v11, 5 }
  0x5d   : > { %v583_v23 = vsub.s32 32, %v582_v18  ;;  %v523_v24 = vsel %vm521_vm12, %v522_v20, %v2075_v15  ;;  %v585_v30 = vshll.u32 %v1869_v31, %v582_v18  ;;  %v588_v57 = vshll.u32 %v1870_v33, %v582_v18 }
  0x5e   : > { %v2092_v25 = vsub.s32 %v420_v52, %v423_v55  ;;  %v675_v32 = vand.u32 2139095040, %v2087_v41  ;;  %v524_v28 = vadd.s32 %v523_v24, %v519_v19  ;;  %v591_v26 = vshll.u32 %v1871_v35, %v582_v18 }
  0x5f   : > { %v586_v36 = vshrl.u32 %v1870_v33, %v583_v23  ;;  %v589_v38 = vshrl.u32 %v1871_v35, %v583_v23  ;;  %v592_v42 = vshrl.u32 %v1872_v37, %v583_v23  ;;  %v594_v43 = vshll.u32 %v1872_v37, %v582_v18 }
  0x60   : > { %v426_v34 = vsub.s32 0, %v2092_v25  ;;  %v525_v46 = vadd.s32 536870912, %v524_v28  ;;  %v2110_v47 = vshll.u32 %v576_v27, 8  ;;  %v672_v49 = vand.u32 2147483647, %v2087_v41 }
  0x61   : > { %v595_v50 = vshrl.u32 %v1873_v39, %v583_v23  ;;  %v597_v51 = vshll.u32 %v1873_v39, %v582_v18  ;;  %v598_v52 = vshrl.u32 %v1874_v48, %v583_v23  ;;  %v676_v53 = vshrl.u32 %v675_v32, 23 }
  0x62   : > { %v1553_v44 = vmin.u32 %v426_v34, %v2092_v25  ;;  %v416_v54 = vadd.s32 %v2044_v22, %v2041_v21  ;;  %v587_v59 = vor.u32 %v586_v36, %v585_v30  ;;  %v590_v61 = vor.u32 %v589_v38, %v588_v57 }
  0x63   : > { %v2118_v1 = vshrl.u32 %v525_v46, 30  ;;  %v593_v2 = vor.u32 %v592_v42, %v591_v26  ;;  %v596_v4 = vor.u32 %v595_v50, %v594_v43  ;;  %vm600_vm14 = vcmp.lt.s32.totalorder %v2103_v40, 1 }
  0x64   : > { %v428_v58 = vclz %v1553_v44  ;;  %v446_v11 = vsub.s32 4, %v2078_v45  ;;  %vm602_vm0 = vcmp.lt.s32.totalorder %v2103_v40, 3  ;;  %vm603_vm1 = vcmp.lt.s32.totalorder %v2103_v40, 4 }
  0x65   : > { %v527_v21 = vshll.u32 %v2118_v1, 30  ;;  %v584_v22 = vshrl.u32 %v1869_v31, %v583_v23  ;;  %v599_v12 = vor.u32 %v598_v52, %v597_v51  ;;  %v609_v13 = vsel %vm603_vm1, %v596_v4, 920167782 }
  0x66   : > { %v1554_v10 = vadd.s32 4294967294, %v428_v58  ;;  %vm601_vm3 = vcmp.lt.s32.totalorder %v2103_v40, 2  ;;  %v608_v3 = vsel %vm600_vm14, %v587_v59, %v590_v61  ;;  %v1564_v15 = vadd.s32 4294967169, %v676_v53 }
  0x67   : > { %v2137_v17 = vsub.s32 %v524_v28, %v527_v21  ;;  %v605_v18 = vsel %vm603_vm1, %v593_v2, 2102212464  ;;  %v610_v55 = vsel %vm602_vm0, %v593_v2, %v609_v13  ;;  %v612_v27 = vsel %vm600_vm14, %v590_v61, %v593_v2 }
  0x68   : > { %vm1555_vm2 = vcmp.lt.s32.totalorder %v1554_v10, 0  ;;  %v447_v24 = vsel %vm362_vm13, %v446_v11, %v2078_v45  ;;  %vm466_vm4 = vcmp.lt.s32.totalorder %v1987_v62, 0  ;;  %v604_v57 = vsel %vm600_vm14, %v584_v22, %v587_v59 }
  0x69   : > { %v431_v56 = vsel %vm1555_vm2, 0, %v1554_v10  ;;  %v530_v30 = vsub.s32 0, %v2137_v17  ;;  %v613_v32 = vsel %vm603_vm1, %v599_v12, 1326507024  ;;  %v606_v28 = vsel %vm602_vm0, %v590_v61, %v605_v18 }
  0x6a   : > { %v432_v19 = vsub.s32 32, %v431_v56  ;;  %v433_v20 = vshll.u32 %v2092_v25, %v431_v56  ;;  %v436_v23 = vsub.s32 4294967266, %v431_v56  ;;  %v614_v36 = vsel %vm602_vm0, %v596_v4, %v613_v32 }
  0x6b   : > { %v1557_v45 = vmin.u32 %v530_v30, %v2137_v17  ;;  %v611_v38 = vsel %vm601_vm3, %v608_v3, %v610_v55  ;;  %v615_v26 = vsel %vm601_vm3, %v612_v27, %v614_v36  ;;  %v682_v42 = vadd.s32 1, %v1564_v15 }
  0x6c   : > { %v434_v34 = vshrl.u32 %v416_v54, %v432_v19  ;;  %v437_v25 = vadd.s32 127, %v436_v23  ;;  %v2165_v46 = vmul.u32.u64.low %v2110_v47, %v615_v26  ;;  %v2166_v50 = vmul.u32.u64.high %v2110_v47, %v615_v26, %v2165_v46 }
  0x6d   : > { %v449_v51 = vsel %vm2123_vm15, 0, %v447_v24  ;;  %v532_v52 = vclz %v1557_v45  ;;  %v550_v53 = vsub.s32 4, %v2118_v1  ;;  %v607_v54 = vsel %vm601_vm3, %v604_v57, %v606_v28 }
  0x6e   : > { %v435_v43 = vor.u32 %v434_v34, %v433_v20  ;;  %v438_v44 = vshll.u32 %v437_v25, 23  ;;  %v2174_v61 = vmul.u32.u64.low %v2110_v47, %v611_v38  ;;  %v2175_v2 = vmul.u32.u64.high %v2110_v47, %v611_v38, %v2174_v61 }
  0x6f   : > { %vm2180_vm5 = vcmp.le.f32.partialorder %v464_v8, 0.7853982  ;;  %v1558_v10 = vadd.s32 4294967294, %v532_v52  ;;  %v2186_v11 = vand.u32 8388607, %v672_v49  ;;  %vm683_vm6 = vcmp.gt.s32.totalorder %v682_v42, 0 }
  0x70   : > { %v439_v58 = vor.u32 4788187, %v438_v44  ;;  %v442_v59 = vcvt.s32.f32 %v435_v43  ;;  %v453_v21 = vadd.s32 3, %v449_v51  ;;  %v520_v22 = vadd.s32 %v2074_v14, %v2082_v16 }
  0x71   : > { %v684_v12 = vsel %vm683_vm6, %v682_v42, 0  ;;  %vm1559_vm7 = vcmp.lt.s32.totalorder %v1558_v10, 0  ;;  %v623_v13 = vmul.u32 %v2110_v47, %v607_v54  ;;  %vm625_vm8 = vc.u32 %v2166_v50, %v2174_v61 }
  0x72   : > { %v440_v40 = vand.u32 2147483647, %v439_v58  ;;  %v686_v8 = vand.u32 31, %v684_v12  ;;  %v535_v15 = vsel %vm1559_vm7, 0, %v1558_v10  ;;  %v551_v56 = vsel %vm466_vm4, %v550_v53, %v2118_v1 }
  0x73   : > { %v626_v18 = vadd.s32 1, %v2175_v2  ;;  %v536_v55 = vsub.s32 32, %v535_v15  ;;  %v537_v19 = vshll.u32 %v2137_v17, %v535_v15  ;;  %v540_v14 = vsub.s32 4294967266, %v535_v15 }
  0x74   : > { %v443_v3 = vmul.f32 %v442_v59, %v440_v40  ;;  %v687_v16 = vsub.s32 32, %v686_v8  ;;  %v2198_v23 = vand.u32 3, %v453_v21  ;;  %v680_v27 = vor.u32 8388608, %v2186_v11 }
  0x75   : > { %v627_v47 = vsel %vm625_vm8, %v626_v18, %v2175_v2  ;;  %v538_v24 = vshrl.u32 %v520_v22, %v536_v55  ;;  %v541_v30 = vadd.s32 127, %v540_v14  ;;  %v553_v57 = vsel %vm2180_vm5, 0, %v551_v56 }
  0x76   : > { %v444_v20 = vxor.u32 2147483648, %v443_v3  ;;  %v628_v1 = vadd.s32 %v627_v47, %v623_v13  ;;  %v689_v17 = vshll.u32 %v1869_v31, %v686_v8  ;;  %v690_v34 = vshrl.u32 %v1870_v33, %v687_v16 }
  0x77   : > { %v692_v25 = vshll.u32 %v1870_v33, %v686_v8  ;;  %v539_v36 = vor.u32 %v538_v24, %v537_v19  ;;  %v542_v45 = vshll.u32 %v541_v30, 23  ;;  %v693_v26 = vshrl.u32 %v1871_v35, %v687_v16 }
  0x78   : > { %v445_v32 = vsel %vm362_vm13, %v444_v20, %v443_v3  ;;  %v629_v38 = vadd.s32 536870912, %v628_v1  ;;  %v695_v42 = vshll.u32 %v1871_v35, %v686_v8  ;;  %v696_v43 = vshrl.u32 %v1872_v37, %v687_v16 }
  0x79   : > { %v448_v28 = vsel %vm2123_vm15, %v1985_v60, %v445_v32  ;;  %v543_v44 = vor.u32 4788187, %v542_v45  ;;  %v546_v46 = vcvt.s32.f32 %v539_v36  ;;  %vm459_vm9 = vcmp.eq.s32.totalorder %v2198_v23, 2 }
  0x7a   : > { %1723 = vcosq.f32 %v448_v28  ;;  %v2215_v51 = vshrl.u32 %v629_v38, 30  ;;  %v685_v52 = vshrl.u32 %v684_v12, 5  ;;  %v698_v9 = vshll.u32 %v1872_v37, %v686_v8 }
  0x7b   : > { %1725 = vsinq.f32 %v448_v28  ;;  %v699_v53 = vshrl.u32 %v1873_v39, %v687_v16  ;;  %v701_v54 = vshll.u32 %v1873_v39, %v686_v8  ;;  %vm456_vm10 = vcmp.eq.s32.totalorder %v2198_v23, 0 }
  0x7c   : > { %v544_v58 = vand.u32 2147483647, %v543_v44  ;;  %v557_v59 = vadd.s32 3, %v553_v57  ;;  %v631_v2 = vshll.u32 %v2215_v51, 30  ;;  %v702_v10 = vshrl.u32 %v1874_v48, %v687_v16 }
  0x7d   : > { %vm455_vm11 = vcmp.lt.s32.totalorder %v2198_v23, 2  ;;  %v688_v11 = vshrl.u32 %v1869_v31, %v687_v16  ;;  %v691_v40 = vor.u32 %v690_v34, %v689_v17  ;;  %v694_v21 = vor.u32 %v693_v26, %v692_v25 }
  0x7e   : > { %v700_v22 = vor.u32 %v699_v53, %v698_v9  ;;  %vm452_vm12 = vweird.f32 %v1985_v60  ;;  %v547_v12 = vmul.f32 %v546_v46, %v544_v58  ;;  %v2227_v13 = vsub.s32 %v628_v1, %v631_v2 }
  0x7f   : > { %v697_v8 = vor.u32 %v696_v43, %v695_v42  ;;  %v703_v3 = vor.u32 %v702_v10, %v701_v54  ;;  %vm704_vm13 = vcmp.lt.s32.totalorder %v685_v52, 1  ;;  %vm707_vm14 = vcmp.lt.s32.totalorder %v685_v52, 4 }
  0x80   : > { %v2229_v15 = vshll.u32 %v680_v27, 8  ;;  %v779_v56 = vand.u32 2139095040, %v1989_v63  ;;  %v548_v18 = vxor.u32 2147483648, %v547_v12  ;;  %v634_v55 = vsub.s32 0, %v2227_v13 }
  0x81   : > { %vm706_vm15 = vcmp.lt.s32.totalorder %v685_v52, 3  ;;  %v709_v19 = vsel %vm707_vm14, %v697_v8, 2102212464  ;;  %vm570_vm0 = vcmp.lt.s32.totalorder %v1996_v5, 0  ;;  %vm705_vm1 = vcmp.lt.s32.totalorder %v685_v52, 2 }
  0x82   : > { %v708_v14 = vsel %vm704_vm13, %v688_v11, %v691_v40  ;;  %v713_v16 = vsel %vm707_vm14, %v700_v22, 920167782  ;;  %v717_v20 = vsel %vm707_vm14, %v703_v3, 1326507024  ;;  %v549_v47 = vsel %vm466_vm4, %v548_v18, %v547_v12 }
  0x83   : > { %v1561_v27 = vmin.u32 %v634_v55, %v2227_v13  ;;  %v710_v24 = vsel %vm706_vm15, %v694_v21, %v709_v19  ;;  %v712_v30 = vsel %vm704_vm13, %v691_v40, %v694_v21  ;;  %v552_v1 = vsel %vm2180_vm5, %v1987_v62, %v549_v47 }
  0x84   : > { %v1724_v57 = vpop.eup %1723  ;;  %v714_v32 = vsel %vm706_vm15, %v697_v8, %v713_v16  ;;  %v716_v17 = vsel %vm704_vm13, %v694_v21, %v697_v8  ;;  %v718_v34 = vsel %vm706_vm15, %v700_v22, %v717_v20  ;;  %1727 = vcosq.f32 %v552_v1 }
  0x85   : > { %v1726_v25 = vpop.eup %1725  ;;  %v460_v28 = vxor.u32 2147483648, %v1724_v57  ;;  %v624_v36 = vadd.s32 %v2174_v61, %v2166_v50  ;;  %v636_v45 = vclz %v1561_v27  ;;  %1729 = vsinq.f32 %v552_v1 }
  0x86   : > { %v457_v38 = vxor.u32 2147483648, %v1726_v25  ;;  %v654_v26 = vsub.s32 4, %v2215_v51  ;;  %v711_v42 = vsel %vm705_vm1, %v708_v14, %v710_v24  ;;  %v715_v44 = vsel %vm705_vm1, %v712_v30, %v714_v32 }
  0x87   : > { %v461_v4 = vsel %vm459_vm9, %v460_v28, %v1726_v25  ;;  %v1562_v43 = vadd.s32 4294967294, %v636_v45  ;;  %v719_v46 = vsel %vm705_vm1, %v716_v17, %v718_v34  ;;  %v780_v53 = vshrl.u32 %v779_v56, 23 }
  0x88   : > { %v458_v9 = vsel %vm456_vm10, %v1724_v57, %v457_v38  ;;  %v2254_v50 = vmul.u32.u64.low %v2229_v15, %v719_v46  ;;  %v2255_v61 = vmul.u32.u64.high %v2229_v15, %v719_v46, %v2254_v50  ;;  %v558_v10 = vand.u32 3, %v557_v59 }
  0x89   : > { %v462_v54 = vsel %vm455_vm11, %v458_v9, %v461_v4  ;;  %vm1563_vm2 = vcmp.lt.s32.totalorder %v1562_v43, 0  ;;  %v2260_v58 = vmul.u32.u64.low %v2229_v15, %v715_v44  ;;  %v2261_v2 = vmul.u32.u64.high %v2229_v15, %v715_v44, %v2260_v58 }
  0x8a   : > { %v463_v52 = vsel %vm452_vm12, nan, %v462_v54  ;;  %v639_v11 = vsel %vm1563_vm2, 0, %v1562_v43  ;;  %v1568_v40 = vadd.s32 4294967169, %v780_v53  ;;  %v655_v23 = vsel %vm570_vm0, %v654_v26, %v2215_v51 }
  0x8b   : > { %v640_v21 = vsub.s32 32, %v639_v11  ;;  %v641_v22 = vshll.u32 %v2227_v13, %v639_v11  ;;  %v644_v12 = vsub.s32 4294967266, %v639_v11  ;;  %1192 = vst [vmem:[#allocation2] sm:$0xff] %v463_v52  ;;  %vm556_vm3 = vweird.f32 %v1987_v62 }
  0x8c   : > { %v727_v8 = vmul.u32 %v2229_v15, %v711_v42  ;;  %vm729_vm4 = vc.u32 %v2255_v61, %v2260_v58  ;;  %v786_v60 = vadd.s32 1, %v1568_v40  ;;  %vm2276_vm5 = vcmp.le.f32.partialorder %v568_v29, 0.7853982 }
  0x8d   : > { %v642_v13 = vshrl.u32 %v624_v36, %v640_v21  ;;  %v645_v3 = vadd.s32 127, %v644_v12  ;;  %v730_v56 = vadd.s32 1, %v2261_v2  ;;  %vm563_vm6 = vcmp.eq.s32.totalorder %v558_v10, 2 }
  0x8e   : > { %v657_v51 = vsel %vm2276_vm5, 0, %v655_v23  ;;  %v776_v15 = vand.u32 2147483647, %v1989_v63  ;;  %vm787_vm7 = vcmp.gt.s32.totalorder %v786_v60, 0  ;;  %v1728_v18 = vpop.eup %1727  ;;  %vm560_vm8 = vcmp.eq.s32.totalorder %v558_v10, 0 }
  0x8f   : > { %v643_v55 = vor.u32 %v642_v13, %v641_v22  ;;  %v646_v19 = vshll.u32 %v645_v3, 23  ;;  %v731_v14 = vsel %vm729_vm4, %v730_v56, %v2261_v2  ;;  %v788_v29 = vsel %vm787_vm7, %v786_v60, 0  ;;  %v1730_v16 = vpop.eup %1729 }
  0x90   : > { %v564_v20 = vxor.u32 2147483648, %v1728_v18  ;;  %v732_v47 = vadd.s32 %v731_v14, %v727_v8  ;;  %v790_v27 = vand.u32 31, %v788_v29  ;;  %vm559_vm9 = vcmp.lt.s32.totalorder %v558_v10, 2 }
  0x91   : > { %v561_v24 = vxor.u32 2147483648, %v1730_v16  ;;  %v647_v30 = vor.u32 4788187, %v646_v19  ;;  %v650_v57 = vcvt.s32.f32 %v643_v55  ;;  %v661_v32 = vadd.s32 3, %v657_v51 }
  0x92   : > { %v565_v1 = vsel %vm563_vm6, %v564_v20, %v1730_v16  ;;  %v733_v17 = vadd.s32 536870912, %v732_v47  ;;  %v791_v34 = vsub.s32 32, %v790_v27  ;;  %v783_v36 = vand.u32 8388607, %v776_v15 }
  0x93   : > { %v562_v25 = vsel %vm560_vm8, %v1728_v18, %v561_v24  ;;  %v648_v28 = vand.u32 2147483647, %v647_v30  ;;  %v789_v45 = vshrl.u32 %v788_v29, 5  ;;  %v793_v42 = vshll.u32 %v1869_v31, %v790_v27 }
  0x94   : > { %v566_v38 = vsel %vm559_vm9, %v562_v25, %v565_v1  ;;  %v2288_v26 = vshrl.u32 %v733_v17, 30  ;;  %v796_v4 = vshll.u32 %v1870_v33, %v790_v27  ;;  %v794_v46 = vshrl.u32 %v1870_v33, %v791_v34 }
  0x95   : > { %v567_v43 = vsel %vm556_vm3, nan, %v566_v38  ;;  %v651_v44 = vmul.f32 %v650_v57, %v648_v28  ;;  %v797_v9 = vshrl.u32 %v1871_v35, %v791_v34  ;;  %v799_v53 = vshll.u32 %v1871_v35, %v790_v27 }
  0x96   : > { %v735_v50 = vshll.u32 %v2288_v26, 30  ;;  %v800_v54 = vshrl.u32 %v1872_v37, %v791_v34  ;;  %v802_v2 = vshll.u32 %v1872_v37, %v790_v27  ;;  %1193 = vst [vmem:[#allocation2 + $0x8] sm:$0xff] %v567_v43  ;;  %v2300_v10 = vand.u32 3, %v661_v32 }
  0x97   : > { %v652_v52 = vxor.u32 2147483648, %v651_v44  ;;  %v784_v11 = vor.u32 8388608, %v783_v36  ;;  %v803_v62 = vshrl.u32 %v1873_v39, %v791_v34  ;;  %v792_v21 = vshrl.u32 %v1869_v31, %v791_v34 }
  0x98   : > { %v2303_v40 = vsub.s32 %v732_v47, %v735_v50  ;;  %v805_v22 = vshll.u32 %v1873_v39, %v790_v27  ;;  %v806_v12 = vshrl.u32 %v1874_v48, %v791_v34  ;;  %v795_v8 = vor.u32 %v794_v46, %v793_v42 }
  0x99   : > { %v653_v23 = vsel %vm570_vm0, %v652_v52, %v651_v44  ;;  %v798_v60 = vor.u32 %v797_v9, %v796_v4  ;;  %v804_v13 = vor.u32 %v803_v62, %v802_v2  ;;  %v801_v51 = vor.u32 %v800_v54, %v799_v53 }
  0x9a   : > { %v656_v3 = vsel %vm2276_vm5, %v1996_v5, %v653_v23  ;;  %v738_v56 = vsub.s32 0, %v2303_v40  ;;  %vm808_vm10 = vcmp.lt.s32.totalorder %v789_v45, 1  ;;  %v807_v18 = vor.u32 %v806_v12, %v805_v22 }
  0x9b   : > { %1731 = vcosq.f32 %v656_v3  ;;  %vm811_vm11 = vcmp.lt.s32.totalorder %v789_v45, 4  ;;  %v883_v55 = vand.u32 2139095040, %v1991_v0  ;;  %vm810_vm12 = vcmp.lt.s32.totalorder %v789_v45, 3 }
  0x9c   : > { %1733 = vsinq.f32 %v656_v3  ;;  %v1565_v19 = vmin.u32 %v738_v56, %v2303_v40  ;;  %v824_v14 = vshll.u32 %v784_v11, 8  ;;  %vm809_vm13 = vcmp.lt.s32.totalorder %v789_v45, 2 }
  0x9d   : > { %v813_v29 = vsel %vm811_vm11, %v801_v51, 2102212464  ;;  %v816_v59 = vsel %vm808_vm10, %v795_v8, %v798_v60  ;;  %v817_v16 = vsel %vm811_vm11, %v804_v13, 920167782  ;;  %v728_v20 = vadd.s32 %v2260_v58, %v2255_v61 }
  0x9e   : > { %v740_v47 = vclz %v1565_v19  ;;  %v812_v27 = vsel %vm808_vm10, %v792_v21, %v795_v8  ;;  %v820_v24 = vsel %vm808_vm10, %v798_v60, %v801_v51  ;;  %v814_v30 = vsel %vm810_vm12, %v798_v60, %v813_v29 }
  0x9f   : > { %v818_v57 = vsel %vm810_vm12, %v801_v51, %v817_v16  ;;  %v821_v1 = vsel %vm811_vm11, %v807_v18, 1326507024  ;;  %v884_v32 = vshrl.u32 %v883_v55, 23  ;;  %vm660_vm14 = vweird.f32 %v1996_v5 }
  0xa0   : > { %v1566_v17 = vadd.s32 4294967294, %v740_v47  ;;  %v758_v34 = vsub.s32 4, %v2288_v26  ;;  %v819_v25 = vsel %vm809_vm13, %v816_v59, %v818_v57  ;;  %v822_v61 = vsel %vm810_vm12, %v804_v13, %v821_v1 }
  0xa1   : > { %v815_v58 = vsel %vm809_vm13, %v812_v27, %v814_v30  ;;  %v823_v28 = vsel %vm809_vm13, %v820_v24, %v822_v61  ;;  %v2332_v36 = vmul.u32.u64.low %v824_v14, %v819_v25  ;;  %v2333_v38 = vmul.u32.u64.high %v824_v14, %v819_v25, %v2332_v36 }
  0xa2   : > { %vm1567_vm15 = vcmp.lt.s32.totalorder %v1566_v17, 0  ;;  %v2336_v42 = vmul.u32.u64.low %v824_v14, %v823_v28  ;;  %v2337_v4 = vmul.u32.u64.high %v824_v14, %v823_v28, %v2336_v42  ;;  %v1572_v43 = vadd.s32 4294967169, %v884_v32 }
  0xa3   : > { %vm663_vm0 = vcmp.lt.s32.totalorder %v2300_v10, 2  ;;  %vm2342_vm1 = vcmp.le.f32.partialorder %v672_v49, 0.7853982  ;;  %vm674_vm2 = vcmp.lt.s32.totalorder %v2087_v41, 0  ;;  %v743_v45 = vsel %vm1567_vm15, 0, %v1566_v17 }
  0xa4   : > { %v744_v46 = vsub.s32 32, %v743_v45  ;;  %v745_v9 = vshll.u32 %v2303_v40, %v743_v45  ;;  %v748_v50 = vsub.s32 4294967266, %v743_v45  ;;  %v890_v53 = vadd.s32 1, %v1572_v43 }
  0xa5   : > { %v1732_v54 = vpop.eup %1731  ;;  %vm664_vm3 = vcmp.eq.s32.totalorder %v2300_v10, 0  ;;  %vm667_vm4 = vcmp.eq.s32.totalorder %v2300_v10, 2  ;;  %v831_v2 = vmul.u32 %v824_v14, %v815_v58  ;;  %v834_v52 = vadd.s32 1, %v2333_v38 }
  0xa6   : > { %v1734_v49 = vpop.eup %1733  ;;  %v668_v11 = vxor.u32 2147483648, %v1732_v54  ;;  %v746_v62 = vshrl.u32 %v728_v20, %v744_v46  ;;  %v749_v21 = vadd.s32 127, %v748_v50  ;;  %v759_v22 = vsel %vm674_vm2, %v758_v34, %v2288_v26 }
  0xa7   : > { %v665_v12 = vxor.u32 2147483648, %v1734_v49  ;;  %vm833_vm5 = vc.u32 %v2337_v4, %v2332_v36  ;;  %v880_v40 = vand.u32 2147483647, %v1991_v0  ;;  %vm891_vm6 = vcmp.gt.s32.totalorder %v890_v53, 0 }
  0xa8   : > { %v669_v23 = vsel %vm667_vm4, %v668_v11, %v1734_v49  ;;  %v747_v8 = vor.u32 %v746_v62, %v745_v9  ;;  %v750_v60 = vshll.u32 %v749_v21, 23  ;;  %v835_v13 = vsel %vm833_vm5, %v834_v52, %v2333_v38 }
  0xa9   : > { %v666_v3 = vsel %vm664_vm3, %v1732_v54, %v665_v12  ;;  %v761_v56 = vsel %vm2342_vm1, 0, %v759_v22  ;;  %v836_v51 = vadd.s32 %v835_v13, %v831_v2  ;;  %v892_v26 = vsel %vm891_vm6, %v890_v53, 0 }
  0xaa   : > { %v670_v18 = vsel %vm663_vm0, %v666_v3, %v669_v23  ;;  %v751_v55 = vor.u32 4788187, %v750_v60  ;;  %v754_v19 = vcvt.s32.f32 %v747_v8  ;;  %v894_v59 = vand.u32 31, %v892_v26 }
  0xab   : > { %v671_v14 = vsel %vm660_vm14, nan, %v670_v18  ;;  %v837_v29 = vadd.s32 536870912, %v836_v51  ;;  %v765_v20 = vadd.s32 3, %v761_v56  ;;  %v887_v47 = vand.u32 8388607, %v880_v40 }
  0xac   : > { %v752_v16 = vand.u32 2147483647, %v751_v55  ;;  %1194 = vst [vmem:[#allocation2 + $0x10] sm:$0xff] %v671_v14  ;;  %v893_v24 = vshrl.u32 %v892_v26, 5  ;;  %v895_v30 = vsub.s32 32, %v894_v59  ;;  %v987_v10 = vand.u32 2139095040, %v1998_v6 }
  0xad   : > { %v2368_v27 = vshrl.u32 %v837_v29, 30  ;;  %v897_v1 = vshll.u32 %v1869_v31, %v894_v59  ;;  %v900_v5 = vshll.u32 %v1870_v33, %v894_v59  ;;  %v903_v32 = vshll.u32 %v1871_v35, %v894_v59 }
  0xae   : > { %v755_v57 = vmul.f32 %v754_v19, %v752_v16  ;;  %v898_v34 = vshrl.u32 %v1870_v33, %v895_v30  ;;  %v906_v25 = vshll.u32 %v1872_v37, %v894_v59  ;;  %v909_v61 = vshll.u32 %v1873_v39, %v894_v59 }
  0xaf   : > { %v839_v17 = vshll.u32 %v2368_v27, 30  ;;  %v901_v28 = vshrl.u32 %v1871_v35, %v895_v30  ;;  %v904_v38 = vshrl.u32 %v1872_v37, %v895_v30  ;;  %v907_v42 = vshrl.u32 %v1873_v39, %v895_v30 }
  0xb0   : > { %v756_v58 = vxor.u32 2147483648, %v755_v57  ;;  %v888_v45 = vor.u32 8388608, %v887_v47  ;;  %v910_v46 = vshrl.u32 %v1874_v48, %v895_v30  ;;  %vm912_vm7 = vcmp.lt.s32.totalorder %v893_v24, 1 }
  0xb1   : > { %v2381_v43 = vsub.s32 %v836_v51, %v839_v17  ;;  %v896_v50 = vshrl.u32 %v1869_v31, %v895_v30  ;;  %v899_v53 = vor.u32 %v898_v34, %v897_v1  ;;  %v902_v54 = vor.u32 %v901_v28, %v900_v5 }
  0xb2   : > { %v757_v9 = vsel %vm674_vm2, %v756_v58, %v755_v57  ;;  %v905_v49 = vor.u32 %v904_v38, %v903_v32  ;;  %v908_v11 = vor.u32 %v907_v42, %v906_v25  ;;  %v911_v62 = vor.u32 %v910_v46, %v909_v61 }
  0xb3   : > { %v760_v2 = vsel %vm2342_vm1, %v2087_v41, %v757_v9  ;;  %v842_v52 = vsub.s32 0, %v2381_v43  ;;  %vm915_vm8 = vcmp.lt.s32.totalorder %v893_v24, 4  ;;  %v988_v21 = vshrl.u32 %v987_v10, 23 }
  0xb4   : > { %1735 = vcosq.f32 %v760_v2  ;;  %vm914_vm9 = vcmp.lt.s32.totalorder %v893_v24, 3  ;;  %v917_v12 = vsel %vm915_vm8, %v905_v49, 2102212464  ;;  %vm913_vm10 = vcmp.lt.s32.totalorder %v893_v24, 2 }
  0xb5   : > { %1737 = vsinq.f32 %v760_v2  ;;  %v1569_v22 = vmin.u32 %v842_v52, %v2381_v43  ;;  %v920_v23 = vsel %vm912_vm7, %v899_v53, %v902_v54  ;;  %v921_v44 = vsel %vm915_vm8, %v908_v11, 920167782 }
  0xb6   : > { %v928_v8 = vshll.u32 %v888_v45, 8  ;;  %vm778_vm11 = vcmp.lt.s32.totalorder %v1989_v63, 0  ;;  %v916_v13 = vsel %vm912_vm7, %v896_v50, %v899_v53  ;;  %v918_v3 = vsel %vm914_vm9, %v902_v54, %v917_v12 }
  0xb7   : > { %v844_v60 = vclz %v1569_v22  ;;  %v924_v56 = vsel %vm912_vm7, %v902_v54, %v905_v49  ;;  %v766_v51 = vand.u32 3, %v765_v20  ;;  %v922_v26 = vsel %vm914_vm9, %v905_v49, %v921_v44 }
  0xb8   : > { %v925_v18 = vsel %vm915_vm8, %v911_v62, 1326507024  ;;  %v1576_v55 = vadd.s32 4294967169, %v988_v21  ;;  %vm764_vm12 = vweird.f32 %v2087_v41  ;;  %v832_v19 = vadd.s32 %v2332_v36, %v2337_v4 }
  0xb9   : > { %v1570_v14 = vadd.s32 4294967294, %v844_v60  ;;  %v923_v29 = vsel %vm913_vm10, %v920_v23, %v922_v26  ;;  %v926_v59 = vsel %vm914_vm9, %v908_v11, %v925_v18  ;;  %v919_v16 = vsel %vm913_vm10, %v916_v13, %v918_v3 }
  0xba   : > { %v927_v47 = vsel %vm913_vm10, %v924_v56, %v926_v59  ;;  %v2408_v20 = vmul.u32.u64.low %v928_v8, %v923_v29  ;;  %v2409_v30 = vmul.u32.u64.high %v928_v8, %v923_v29, %v2408_v20  ;;  %v994_v1 = vadd.s32 1, %v1576_v55 }
  0xbb   : > { %vm1571_vm13 = vcmp.lt.s32.totalorder %v1570_v14, 0  ;;  %v2412_v10 = vmul.u32.u64.low %v928_v8, %v927_v47  ;;  %v2413_v57 = vmul.u32.u64.high %v928_v8, %v927_v47, %v2412_v10  ;;  %vm767_vm14 = vcmp.lt.s32.totalorder %v766_v51, 2 }
  0xbc   : > { %vm771_vm15 = vcmp.eq.s32.totalorder %v766_v51, 2  ;;  %v847_v36 = vsel %vm1571_vm13, 0, %v1570_v14  ;;  %v862_v4 = vsub.s32 4, %v2368_v27  ;;  %vm995_vm0 = vcmp.gt.s32.totalorder %v994_v1, 0 }
  0xbd   : > { %v848_v5 = vsub.s32 32, %v847_v36  ;;  %v849_v32 = vshll.u32 %v2381_v43, %v847_v36  ;;  %v852_v17 = vsub.s32 4294967266, %v847_v36  ;;  %vm2419_vm1 = vcmp.le.f32.partialorder %v776_v15, 0.7853982 }
  0xbe   : > { %v1736_v24 = vpop.eup %1735  ;;  %v935_v25 = vmul.u32 %v928_v8, %v919_v16  ;;  %v938_v61 = vadd.s32 1, %v2409_v30  ;;  %v984_v58 = vand.u32 2147483647, %v1998_v6  ;;  %v996_v28 = vsel %vm995_vm0, %v994_v1, 0 }
  0xbf   : > { %v1738_v38 = vpop.eup %1737  ;;  %vm768_vm2 = vcmp.eq.s32.totalorder %v766_v51, 0  ;;  %v772_v42 = vxor.u32 2147483648, %v1736_v24  ;;  %v850_v45 = vshrl.u32 %v832_v19, %v848_v5  ;;  %v853_v43 = vadd.s32 127, %v852_v17 }
  0xc0   : > { %v769_v46 = vxor.u32 2147483648, %v1738_v38  ;;  %v863_v9 = vsel %vm778_vm11, %v862_v4, %v2368_v27  ;;  %vm937_vm3 = vc.u32 %v2413_v57, %v2408_v20  ;;  %v998_v15 = vand.u32 31, %v996_v28 }
  0xc1   : > { %v773_v50 = vsel %vm771_vm15, %v772_v42, %v1738_v38  ;;  %v851_v53 = vor.u32 %v850_v45, %v849_v32  ;;  %v854_v54 = vshll.u32 %v853_v43, 23  ;;  %v939_v2 = vsel %vm937_vm3, %v938_v61, %v2409_v30 }
  0xc2   : > { %v770_v52 = vsel %vm768_vm2, %v1736_v24, %v769_v46  ;;  %v940_v49 = vadd.s32 %v939_v2, %v935_v25  ;;  %v991_v11 = vand.u32 8388607, %v984_v58  ;;  %v999_v62 = vsub.s32 32, %v998_v15 }
  0xc3   : > { %v774_v21 = vsel %vm767_vm14, %v770_v52, %v773_v50  ;;  %v855_v22 = vor.u32 4788187, %v854_v54  ;;  %v858_v27 = vcvt.s32.f32 %v851_v53  ;;  %v997_v12 = vshrl.u32 %v996_v28, 5 }
  0xc4   : > { %v775_v23 = vsel %vm764_vm12, nan, %v774_v21  ;;  %v941_v44 = vadd.s32 536870912, %v940_v49  ;;  %v1001_v8 = vshll.u32 %v1869_v31, %v998_v15  ;;  %v1004_v60 = vshll.u32 %v1870_v33, %v998_v15 }
  0xc5   : > { %v856_v13 = vand.u32 2147483647, %v855_v22  ;;  %v1002_v3 = vshrl.u32 %v1870_v33, %v999_v62  ;;  %v1005_v56 = vshrl.u32 %v1871_v35, %v999_v62  ;;  %v1007_v26 = vshll.u32 %v1871_v35, %v998_v15  ;;  %1195 = vst [vmem:[#allocation2 + $0x18] sm:$0xff] %v775_v23 }
  0xc6   : > { %v2442_v51 = vshrl.u32 %v941_v44, 30  ;;  %v1008_v18 = vshrl.u32 %v1872_v37, %v999_v62  ;;  %v1010_v41 = vshll.u32 %v1872_v37, %v998_v15  ;;  %v1011_v55 = vshrl.u32 %v1873_v39, %v999_v62 }
  0xc7   : > { %v859_v19 = vmul.f32 %v858_v27, %v856_v13  ;;  %v865_v14 = vsel %vm2419_vm1, 0, %v863_v9  ;;  %v1013_v29 = vshll.u32 %v1873_v39, %v998_v15  ;;  %v992_v16 = vor.u32 8388608, %v991_v11 }
  0xc8   : > { %v943_v59 = vshll.u32 %v2442_v51, 30  ;;  %v1000_v47 = vshrl.u32 %v1869_v31, %v999_v62  ;;  %v1014_v30 = vshrl.u32 %v1874_v48, %v999_v62  ;;  %v1003_v1 = vor.u32 %v1002_v3, %v1001_v8 }
  0xc9   : > { %v860_v10 = vxor.u32 2147483648, %v859_v19  ;;  %v1006_v36 = vor.u32 %v1005_v56, %v1004_v60  ;;  %v1012_v4 = vor.u32 %v1011_v55, %v1010_v41  ;;  %v1009_v32 = vor.u32 %v1008_v18, %v1007_v26 }
  0xca   : > { %v944_v5 = vsub.s32 %v940_v49, %v943_v59  ;;  %vm1016_vm4 = vcmp.lt.s32.totalorder %v997_v12, 1  ;;  %vm1019_vm5 = vcmp.lt.s32.totalorder %v997_v12, 4  ;;  %v869_v24 = vadd.s32 3, %v865_v14 }
  0xcb   : > { %v861_v17 = vsel %vm778_vm11, %v860_v10, %v859_v19  ;;  %v1015_v25 = vor.u32 %v1014_v30, %v1013_v29  ;;  %vm1018_vm6 = vcmp.lt.s32.totalorder %v997_v12, 3  ;;  %vm1017_vm7 = vcmp.lt.s32.totalorder %v997_v12, 2 }
  0xcc   : > { %v864_v61 = vsel %vm2419_vm1, %v1989_v63, %v861_v17  ;;  %v946_v28 = vsub.s32 0, %v944_v5  ;;  %v1021_v38 = vsel %vm1019_vm5, %v1009_v32, 2102212464  ;;  %v1024_v42 = vsel %vm1016_vm4, %v1003_v1, %v1006_v36 }
  0xcd   : > { %1739 = vcosq.f32 %v864_v61  ;;  %v1025_v45 = vsel %vm1019_vm5, %v1012_v4, 920167782  ;;  %v1032_v43 = vshll.u32 %v992_v16, 8  ;;  %v1020_v9 = vsel %vm1016_vm4, %v1000_v47, %v1003_v1 }
  0xce   : > { %1741 = vsinq.f32 %v864_v61  ;;  %v1573_v46 = vmin.u32 %v946_v28, %v944_v5  ;;  %v1026_v15 = vsel %vm1018_vm6, %v1009_v32, %v1025_v45  ;;  %v1022_v50 = vsel %vm1018_vm6, %v1006_v36, %v1021_v38 }
  0xcf   : > { %v1027_v34 = vsel %vm1017_vm7, %v1024_v42, %v1026_v15  ;;  %v1028_v53 = vsel %vm1016_vm4, %v1006_v36, %v1009_v32  ;;  %v1029_v54 = vsel %vm1019_vm5, %v1015_v25, 1326507024  ;;  %v1023_v21 = vsel %vm1017_vm7, %v1020_v9, %v1022_v50 }
  0xd0   : > { %v948_v2 = vclz %v1573_v46  ;;  %v1030_v52 = vsel %vm1018_vm6, %v1012_v4, %v1029_v54  ;;  %v2468_v49 = vmul.u32.u64.low %v1032_v43, %v1027_v34  ;;  %v2469_v11 = vmul.u32.u64.high %v1032_v43, %v1027_v34, %v2468_v49 }
  0xd1   : > { %v1031_v22 = vsel %vm1017_vm7, %v1028_v53, %v1030_v52  ;;  %v1091_v27 = vand.u32 2139095040, %v2000_v7  ;;  %v870_v23 = vand.u32 3, %v869_v24  ;;  %v936_v60 = vadd.s32 %v2408_v20, %v2413_v57 }
  0xd2   : > { %v1574_v62 = vadd.s32 4294967294, %v948_v2  ;;  %v2475_v44 = vmul.u32.u64.low %v1032_v43, %v1031_v22  ;;  %v2476_v8 = vmul.u32.u64.high %v1032_v43, %v1031_v22, %v2475_v44  ;;  %v1039_v56 = vmul.u32 %v1032_v43, %v1023_v21 }
  0xd3   : > { %v1092_v13 = vshrl.u32 %v1091_v27, 23  ;;  %v1042_v26 = vadd.s32 1, %v2469_v11  ;;  %vm868_vm9 = vweird.f32 %v1989_v63  ;;  %vm872_vm10 = vcmp.eq.s32.totalorder %v870_v23, 0 }
  0xd4   : > { %vm1575_vm8 = vcmp.lt.s32.totalorder %v1574_v62, 0  ;;  %vm875_vm11 = vcmp.eq.s32.totalorder %v870_v23, 2  ;;  %vm1041_vm12 = vc.u32 %v2476_v8, %v2468_v49  ;;  %vm871_vm13 = vcmp.lt.s32.totalorder %v870_v23, 2 }
  0xd5   : > { %v951_v3 = vsel %vm1575_vm8, 0, %v1574_v62  ;;  %v1580_v12 = vadd.s32 4294967169, %v1092_v13  ;;  %v1043_v59 = vsel %vm1041_vm12, %v1042_v26, %v2469_v11  ;;  %v1088_v4 = vand.u32 2147483647, %v2000_v7 }
  0xd6   : > { %v952_v18 = vsub.s32 32, %v951_v3  ;;  %v953_v41 = vshll.u32 %v944_v5, %v951_v3  ;;  %v956_v55 = vsub.s32 4294967266, %v951_v3  ;;  %v1044_v47 = vadd.s32 %v1043_v59, %v1039_v56 }
  0xd7   : > { %v1740_v19 = vpop.eup %1739  ;;  %v1098_v30 = vadd.s32 1, %v1580_v12  ;;  %v966_v32 = vsub.s32 4, %v2442_v51  ;;  %vm882_vm15 = vcmp.lt.s32.totalorder %v1991_v0, 0  ;;  %vm2495_vm0 = vcmp.le.f32.partialorder %v880_v40, 0.7853982 }
  0xd8   : > { %v1742_v14 = vpop.eup %1741  ;;  %v876_v20 = vxor.u32 2147483648, %v1740_v19  ;;  %v954_v57 = vshrl.u32 %v936_v60, %v952_v18  ;;  %v957_v29 = vadd.s32 127, %v956_v55  ;;  %v1045_v17 = vadd.s32 536870912, %v1044_v47 }
  0xd9   : > { %v873_v16 = vxor.u32 2147483648, %v1742_v14  ;;  %vm1099_vm14 = vcmp.gt.s32.totalorder %v1098_v30, 0  ;;  %v1095_v15 = vand.u32 8388607, %v1088_v4  ;;  %v967_v34 = vsel %vm882_vm15, %v966_v32, %v2442_v51 }
  0xda   : > { %v877_v10 = vsel %vm875_vm11, %v876_v20, %v1742_v14  ;;  %v955_v1 = vor.u32 %v954_v57, %v953_v41  ;;  %v958_v36 = vshll.u32 %v957_v29, 23  ;;  %v1100_v28 = vsel %vm1099_vm14, %v1098_v30, 0 }
  0xdb   : > { %v874_v5 = vsel %vm872_vm10, %v1740_v19, %v873_v16  ;;  %v2490_v42 = vshrl.u32 %v1045_v17, 30  ;;  %v1102_v45 = vand.u32 31, %v1100_v28  ;;  %v1101_v53 = vshrl.u32 %v1100_v28, 5 }
  0xdc   : > { %v878_v24 = vsel %vm871_vm13, %v874_v5, %v877_v10  ;;  %v959_v25 = vor.u32 4788187, %v958_v36  ;;  %v962_v61 = vcvt.s32.f32 %v955_v1  ;;  %v969_v51 = vsel %vm2495_vm0, 0, %v967_v34 }
  0xdd   : > { %v879_v38 = vsel %vm868_vm9, nan, %v878_v24  ;;  %v1047_v9 = vshll.u32 %v2490_v42, 30  ;;  %v1103_v63 = vsub.s32 32, %v1102_v45  ;;  %v1105_v54 = vshll.u32 %v1869_v31, %v1102_v45 }
  0xde   : > { %v960_v43 = vand.u32 2147483647, %v959_v25  ;;  %1196 = vst [vmem:[#allocation2 + $0x20] sm:$0xff] %v879_v38  ;;  %v1108_v52 = vshll.u32 %v1870_v33, %v1102_v45  ;;  %v1111_v11 = vshll.u32 %v1871_v35, %v1102_v45  ;;  %v1114_v27 = vshll.u32 %v1872_v37, %v1102_v45 }
  0xdf   : > { %v2506_v2 = vsub.s32 %v1044_v47, %v1047_v9  ;;  %v1106_v40 = vshrl.u32 %v1870_v33, %v1103_v63  ;;  %v1109_v21 = vshrl.u32 %v1871_v35, %v1103_v63  ;;  %v1112_v22 = vshrl.u32 %v1872_v37, %v1103_v63 }
  0xe0   : > { %v963_v50 = vmul.f32 %v962_v61, %v960_v43  ;;  %v1096_v44 = vor.u32 8388608, %v1095_v15  ;;  %v1115_v60 = vshrl.u32 %v1873_v39, %v1103_v63  ;;  %v1104_v13 = vshrl.u32 %v1869_v31, %v1103_v63 }
  0xe1   : > { %v1050_v23 = vsub.s32 0, %v2506_v2  ;;  %v1107_v3 = vor.u32 %v1106_v40, %v1105_v54  ;;  %v1117_v35 = vshll.u32 %v1873_v39, %v1102_v45  ;;  %v1110_v26 = vor.u32 %v1109_v21, %v1108_v52 }
  0xe2   : > { %v964_v62 = vxor.u32 2147483648, %v963_v50  ;;  %v1113_v18 = vor.u32 %v1112_v22, %v1111_v11  ;;  %v1116_v41 = vor.u32 %v1115_v60, %v1114_v27  ;;  %v1118_v55 = vshrl.u32 %v1874_v48, %v1103_v63 }
  0xe3   : > { %v1577_v56 = vmin.u32 %v1050_v23, %v2506_v2  ;;  %vm1120_vm1 = vcmp.lt.s32.totalorder %v1101_v53, 1  ;;  %v973_v12 = vadd.s32 3, %v969_v51  ;;  %v1136_v31 = vshll.u32 %v1096_v44, 8 }
  0xe4   : > { %v965_v33 = vsel %vm882_vm15, %v964_v62, %v963_v50  ;;  %v1119_v14 = vor.u32 %v1118_v55, %v1117_v35  ;;  %vm1121_vm2 = vcmp.lt.s32.totalorder %v1101_v53, 2  ;;  %vm1122_vm3 = vcmp.lt.s32.totalorder %v1101_v53, 3 }
  0xe5   : > { %v968_v37 = vsel %vm2495_vm0, %v1991_v0, %v965_v33  ;;  %v1052_v19 = vclz %v1577_v56  ;;  %vm1123_vm4 = vcmp.lt.s32.totalorder %v1101_v53, 4  ;;  %v1124_v20 = vsel %vm1120_vm1, %v1104_v13, %v1107_v3 }
  0xe6   : > { %1743 = vcosq.f32 %v968_v37  ;;  %v1125_v57 = vsel %vm1123_vm4, %v1113_v18, 2102212464  ;;  %v1128_v29 = vsel %vm1120_vm1, %v1107_v3, %v1110_v26  ;;  %v1129_v16 = vsel %vm1123_vm4, %v1116_v41, 920167782 }
  0xe7   : > { %1745 = vsinq.f32 %v968_v37  ;;  %v1578_v39 = vadd.s32 4294967294, %v1052_v19  ;;  %v1126_v59 = vsel %vm1122_vm3, %v1110_v26, %v1125_v57  ;;  %v1132_v47 = vsel %vm1120_vm1, %v1110_v26, %v1113_v18 }
  0xe8   : > { %v1133_v30 = vsel %vm1123_vm4, %v1119_v14, 1326507024  ;;  %v1040_v48 = vadd.s32 %v2468_v49, %v2476_v8  ;;  %v1130_v10 = vsel %vm1122_vm3, %v1113_v18, %v1129_v16  ;;  %v974_v36 = vand.u32 3, %v973_v12 }
  0xe9   : > { %vm1579_vm5 = vcmp.lt.s32.totalorder %v1578_v39, 0  ;;  %v1134_v1 = vsel %vm1122_vm3, %v1116_v41, %v1133_v30  ;;  %v1131_v32 = vsel %vm1121_vm2, %v1128_v29, %v1130_v10  ;;  %v1127_v28 = vsel %vm1121_vm2, %v1124_v20, %v1126_v59 }
  0xea   : > { %v1055_v5 = vsel %vm1579_vm5, 0, %v1578_v39  ;;  %v1135_v17 = vsel %vm1121_vm2, %v1132_v47, %v1134_v1  ;;  %v2536_v43 = vmul.u32.u64.low %v1136_v31, %v1131_v32  ;;  %v2537_v49 = vmul.u32.u64.high %v1136_v31, %v1131_v32, %v2536_v43 }
  0xeb   : > { %v1056_v24 = vsub.s32 32, %v1055_v5  ;;  %v1057_v25 = vshll.u32 %v2506_v2, %v1055_v5  ;;  %v1060_v61 = vsub.s32 4294967266, %v1055_v5  ;;  %vm976_vm6 = vcmp.eq.s32.totalorder %v974_v36, 0 }
  0xec   : > { %v2533_v38 = vmul.u32.u64.low %v1136_v31, %v1135_v17  ;;  %v2534_v45 = vmul.u32.u64.high %v1136_v31, %v1135_v17, %v2533_v38  ;;  %vm979_vm7 = vcmp.eq.s32.totalorder %v974_v36, 2  ;;  %v1143_v54 = vmul.u32 %v1136_v31, %v1127_v28 }
  0xed   : > { %v1058_v8 = vshrl.u32 %v1040_v48, %v1056_v24  ;;  %v1061_v46 = vadd.s32 127, %v1060_v61  ;;  %vm975_vm8 = vcmp.lt.s32.totalorder %v974_v36, 2  ;;  %v1146_v53 = vadd.s32 1, %v2537_v49 }
  0xee   : > { %vm1145_vm9 = vc.u32 %v2534_v45, %v2536_v43  ;;  %vm972_vm10 = vweird.f32 %v1991_v0  ;;  %v1070_v51 = vsub.s32 4, %v2490_v42  ;;  %vm986_vm11 = vcmp.lt.s32.totalorder %v1998_v6, 0 }
  0xef   : > { %v1059_v50 = vor.u32 %v1058_v8, %v1057_v25  ;;  %v1062_v34 = vshll.u32 %v1061_v46, 23  ;;  %v1147_v21 = vsel %vm1145_vm9, %v1146_v53, %v2537_v49  ;;  %vm985_vm12 = vcmp.le.f32.partialorder %v984_v58, 0.7853982 }
  0xf0   : > { %v1744_v9 = vpop.eup %1743  ;;  %v1148_v23 = vadd.s32 %v1147_v21, %v1143_v54  ;;  %v1071_v13 = vsel %vm986_vm11, %v1070_v51, %v2490_v42  ;;  %v1144_v58 = vadd.s32 %v2536_v43, %v2534_v45  ;;  %vm1076_vm1 = vweird.f32 %v1998_v6 }
  0xf1   : > { %v1746_v15 = vpop.eup %1745  ;;  %v980_v63 = vxor.u32 2147483648, %v1744_v9  ;;  %v1063_v52 = vor.u32 4788187, %v1062_v34  ;;  %v1066_v11 = vcvt.s32.f32 %v1059_v50  ;;  %v1073_v26 = vsel %vm985_vm12, 0, %v1071_v13 }
  0xf2   : > { %v977_v2 = vxor.u32 2147483648, %v1746_v15  ;;  %v1149_v33 = vadd.s32 536870912, %v1148_v23  ;;  %v1077_v41 = vadd.s32 3, %v1073_v26  ;;  %vm1090_vm2 = vcmp.lt.s32.totalorder %v2000_v7, 0 }
  0xf3   : > { %v981_v40 = vsel %vm979_vm7, %v980_v63, %v1746_v15  ;;  %v1064_v27 = vand.u32 2147483647, %v1063_v52  ;;  %vm1089_vm3 = vcmp.le.f32.partialorder %v1088_v4, 0.7853982  ;;  %vm1180_vm7 = vweird.f32 %v2000_v7 }
  0xf4   : > { %v978_v62 = vsel %vm976_vm6, %v1744_v9, %v977_v2  ;;  %v1150_v3 = vshrl.u32 %v1149_v33, 30  ;;  %v1078_v19 = vand.u32 3, %v1077_v41 }
  0xf5   : > { %v982_v22 = vsel %vm975_vm8, %v978_v62, %v981_v40  ;;  %v1067_v60 = vmul.f32 %v1066_v11, %v1064_v27 }
  0xf6   : > { %v983_v44 = vsel %vm972_vm10, nan, %v982_v22  ;;  %v1151_v37 = vshll.u32 %v1150_v3, 30  ;;  %vm1083_vm13 = vcmp.eq.s32.totalorder %v1078_v19, 2  ;;  %vm1079_vm15 = vcmp.lt.s32.totalorder %v1078_v19, 2 }
  0xf7   : > { %1197 = vst [vmem:[#allocation2 + $0x28] sm:$0xff] %v983_v44  ;;  %v1068_v0 = vxor.u32 2147483648, %v1067_v60  ;;  %vm1080_vm0 = vcmp.eq.s32.totalorder %v1078_v19, 0  ;;  %v1174_v28 = vsub.s32 4, %v1150_v3 }
  0xf8   : > { %v1152_v18 = vsub.s32 %v1148_v23, %v1151_v37 }
  0xf9   : > { %v1069_v35 = vsel %vm986_vm11, %v1068_v0, %v1067_v60  ;;  %v1175_v45 = vsel %vm1090_vm2, %v1174_v28, %v1150_v3 }
  0xfa   : > { %v1072_v56 = vsel %vm985_vm12, %v1998_v6, %v1069_v35  ;;  %v1154_v55 = vsub.s32 0, %v1152_v18  ;;  %v1177_v8 = vsel %vm1089_vm3, 0, %v1175_v45 }
  0xfb   : > { %1747 = vcosq.f32 %v1072_v56  ;;  %v1181_v46 = vadd.s32 3, %v1177_v8 }
  0xfc   : > { %1749 = vsinq.f32 %v1072_v56  ;;  %v1581_v12 = vmin.u32 %v1154_v55, %v1152_v18 }
  0xfd   : > { %v1182_v9 = vand.u32 3, %v1181_v46 }
  0xfe   : > { %v1156_v31 = vclz %v1581_v12 }
  0xff   : > { %vm1187_vm4 = vcmp.eq.s32.totalorder %v1182_v9, 2  ;;  %vm1184_vm5 = vcmp.eq.s32.totalorder %v1182_v9, 0  ;;  %vm1183_vm6 = vcmp.lt.s32.totalorder %v1182_v9, 2 }
 0x100   : > { %v1582_v14 = vadd.s32 4294967294, %v1156_v31 }
 0x102   : > { %vm1583_vm14 = vcmp.lt.s32.totalorder %v1582_v14, 0 }
 0x103   : > { %v1159_v57 = vsel %vm1583_vm14, 0, %v1582_v14 }
 0x104   : > { %v1160_v59 = vsub.s32 32, %v1159_v57  ;;  %v1161_v16 = vshll.u32 %v1152_v18, %v1159_v57  ;;  %v1164_v47 = vsub.s32 4294967266, %v1159_v57 }
 0x105   : > { %v1748_v39 = vpop.eup %1747 }
 0x106   : > { %v1750_v42 = vpop.eup %1749  ;;  %v1084_v20 = vxor.u32 2147483648, %v1748_v39  ;;  %v1162_v10 = vshrl.u32 %v1144_v58, %v1160_v59  ;;  %v1165_v1 = vadd.s32 127, %v1164_v47 }
 0x107   : > { %v1081_v29 = vxor.u32 2147483648, %v1750_v42 }
 0x108   : > { %v1085_v30 = vsel %vm1083_vm13, %v1084_v20, %v1750_v42  ;;  %v1163_v32 = vor.u32 %v1162_v10, %v1161_v16  ;;  %v1166_v17 = vshll.u32 %v1165_v1, 23 }
 0x109   : > { %v1082_v48 = vsel %vm1080_vm0, %v1748_v39, %v1081_v29 }
 0x10a   : > { %v1086_v36 = vsel %vm1079_vm15, %v1082_v48, %v1085_v30  ;;  %v1167_v24 = vor.u32 4788187, %v1166_v17  ;;  %v1170_v25 = vcvt.s32.f32 %v1163_v32 }
 0x10b   : > { %v1087_v5 = vsel %vm1076_vm1, nan, %v1086_v36 }
 0x10c   : > { %1198 = vst [vmem:[#allocation2 + $0x30] sm:$0xff] %v1087_v5  ;;  %v1168_v61 = vand.u32 2147483647, %v1167_v24 }
 0x10e   : > { %v1171_v38 = vmul.f32 %v1170_v25, %v1168_v61 }
 0x110   : > { %v1172_v6 = vxor.u32 2147483648, %v1171_v38 }
 0x112   : > { %v1173_v43 = vsel %vm1090_vm2, %v1172_v6, %v1171_v38 }
 0x113   : > { %v1176_v49 = vsel %vm1089_vm3, %v2000_v7, %v1173_v43 }
 0x114   : > { %1751 = vcosq.f32 %v1176_v49 }
 0x115   : > { %1753 = vsinq.f32 %v1176_v49 }
 0x11e   : > { %v1752_v15 = vpop.eup %1751 }
 0x11f   : > { %v1754_v63 = vpop.eup %1753  ;;  %v1188_v50 = vxor.u32 2147483648, %v1752_v15 }
 0x120   : > { %v1185_v34 = vxor.u32 2147483648, %v1754_v63 }
 0x121   : > { %v1189_v4 = vsel %vm1187_vm4, %v1188_v50, %v1754_v63 }
 0x122   : > { %v1186_v54 = vsel %vm1184_vm5, %v1752_v15, %v1185_v34 }
 0x123   : > { %v1190_v2 = vsel %vm1183_vm6, %v1186_v54, %v1189_v4 }
 0x124   : > { %v1191_v53 = vsel %vm1180_vm7, nan, %v1190_v2 }
 0x125   : > { %1199 = vst [vmem:[#allocation2 + $0x38] sm:$0xff] %v1191_v53 }
 0x126 PF: > { %v1205_v40 = vld [vmem:[%s1970_s9 + $0x8] sm:$0xff]  ;;  %v1207_v52 = vld [vmem:[%s1970_s9 + $0x18] sm:$0xff]  ;;  %v1204_v11 = vld [vmem:[%s1970_s9] sm:$0xff]  ;;  %v1875_v27 = vmov 0.0   ;;  %v1876_v33 = vmov 0   ;;  %vm1251_vm8 = vcmask 1043456  }
 0x127   : > { %v1600_v62 = vpack.c.bf16 %v1207_v52, %v1205_v40  ;;  %v1206_v21 = vld [vmem:[%s1970_s9 + $0x10] sm:$0xff]  ;;  %v1209_v7 = vld [vmem:[%s1970_s9 + $0x28] sm:$0xff]  ;;  %v1211_v22 = vld [vmem:[%s1970_s9 + $0x38] sm:$0xff]  ;;  %1322 = vmatprep.mubr.f32.mxu0 %v1875_v27  ;;  %1334 = vmatprep.mubr.f32.mxu1 %v1875_v27  ;;  %vm1238_vm9 = vcmask 293888   ;;  %s1598_s21 = sshll.u32 %s1859_s18, 10  ;;  %s1426_s30 = sshll.u32 %s1974_s11, 4  ;;  %s2636_s30 = int_to_ptr.vmem [resolvable:$true] %s1426_s30 }
 0x128   : > { %v1602_v51 = vpack.c.bf16 %v1206_v21, %v1204_v11  ;;  %v1604_v23 = vpack.c.bf16 %v1211_v22, %v1209_v7  ;;  %v1208_v44 = vld [vmem:[%s1970_s9 + $0x20] sm:$0xff]  ;;  %v1210_v60 = vld [vmem:[%s1970_s9 + $0x30] sm:$0xff]  ;;  %1756 = vset.pattern.permute.xlu1 %v1876_v33  ;;  %1755 = vset.pattern.permute.xlu0 %v1876_v33  ;;  %v1213_v35 = vld [vmem:[%s1970_s9 + $0x48] sm:$0xf]  ;;  %s2633_s26 = scalar_lea.hbm %s2744_s4, %s1598_s21  ;;  %s1393_s5 = scalar_lea.sflag [#allocation6], %s1962_s29 }
 0x129   : > { %1601 = vmatprep.subr.bf16.mxu0 %v1600_v62  ;;  %1608 = vmatprep.subr.bf16.mxu1 %v1600_v62  ;;  %v1606_v0 = vpack.c.bf16 %v1210_v60, %v1208_v44  ;;  %v1216_v13 = vld [vmem:[%s2741_s1 + $0x10] sm:$0xff]  ;;  %v1214_v3 = vld [vmem:[%s2741_s1] sm:$0xff]  ;;  %v1217_v37 = vld [vmem:[%s2741_s1 + $0x18] sm:$0xff]  ;;  %s1757_s6 = scalar_lea.vmem %s2636_s30, 1024  ;;  %s1877_s7 = smov [#allocation5]  }
 0x12a   : > { %1603 = vmatpush1.bf16.msra.mxu0 %v1602_v51  ;;  %1611 = vmatpush1.bf16.msra.mxu1 %v1602_v51  ;;  %v1215_v56 = vld [vmem:[%s2741_s1 + $0x8] sm:$0xff]  ;;  %v1212_v26 = vld [vmem:[%s1970_s9 + $0x40] sm:$0xf]  ;;  %v1202_v41 = vld [vmem:[%s2740_s0 + $0x10] sm:$0xff]  ;;  %p1758_p13 = scmp.ne.s32.totalorder %s2636_s30, %s1757_s6  ;;  %s1761_s8 = sshll.u32 %s1877_s7, 4  ;;  %s1762_s8 = int_to_ptr.vmem [resolvable:$false] %s1761_s8 }
 0x12b   : > { %1605 = vmatprep.subr.bf16.mxu0 %v1604_v23  ;;  %1609 = vmatprep.subr.bf16.mxu1 %v1604_v23  ;;  %v1200_v18 = vld [vmem:[%s2740_s0] sm:$0xff]  ;;  %v1201_v55 = vld [vmem:[%s2740_s0 + $0x8] sm:$0xff]  ;;  %v1203_v12 = vld [vmem:[%s2740_s0 + $0x18] sm:$0xff]  ;;  %s1763_s9 = scalar_lea.vmem %s1762_s8, 2048  ;;  %p1764_p2 = scmp.lt.s32.totalorder %s2636_s30, %s1762_s8 }
 0x12c   : > { %1230 = vperm.xlu1 %1756, %v1216_v13   ;;  %1220 = vperm.xlu0 %1755, %v1214_v3   ;;  %v2595_v19 = vld [vmem:[#allocation2] sm:$0xff]  ;;  %v2603_v14 = vld [vmem:[#allocation2 + $0x8] sm:$0xff]  ;;  %v2611_v58 = vld [vmem:[#allocation2 + $0x10] sm:$0xff]  ;;  %p1759_p0 = pnand %p1758_p13, %p1946_p4  ;;  %p1765_p3 = scmp.lt.s32.totalorder %s1763_s9, %s1757_s6 }
 0x12d   : > { %1363 = vst [vmem:[%s1974_s11] sm:$0xff] %v2595_v19  ;;  %v2599_v31 = vld [vmem:[#allocation2 + $0x20] sm:$0xff]  ;;  %v2605_v39 = vld [vmem:[#allocation2 + $0x28] sm:$0xff]  ;;  %1364 = vst [vmem:[%s1974_s11 + $0x8] sm:$0xff] %v2603_v14 }
 0x12e   : > { %1607 = vmatpush1.bf16.msra.mxu0 %v1606_v0  ;;  %1612 = vmatpush1.bf16.msra.mxu1 %v1606_v0  ;;  %1367 = vst [vmem:[%s1974_s11 + $0x20] sm:$0xff] %v2599_v31  ;;  %1368 = vst [vmem:[%s1974_s11 + $0x28] sm:$0xff] %v2605_v39  ;;  %v2613_v42 = vld [vmem:[#allocation2 + $0x30] sm:$0xff]  ;;  %v2619_v20 = vld [vmem:[#allocation2 + $0x18] sm:$0xff]  ;;  %p1760_p1 = pneg %p1759_p0  ;;  %p1766_p5 = por %p1765_p3, %p1764_p2 }
 0x12f   : > { %1584 = vmatprep.subr.msk.mxu0 %vm1251_vm8, %v1213_v35  ;;  %1610 = vmatprep.subr.msk.mxu1 %vm1251_vm8, %v1213_v35  ;;  %1365 = vst [vmem:[%s1974_s11 + $0x10] sm:$0xff] %v2611_v58  ;;  %1369 = vst [vmem:[%s1974_s11 + $0x30] sm:$0xff] %v2613_v42  ;;  %v2621_v57 = vld [vmem:[#allocation2 + $0x38] sm:$0xff] }
 0x130   : > { %1235 = vperm.xlu1 %1756, %v1217_v37   ;;  %1225 = vperm.xlu0 %1755, %v1215_v56   ;;  %1366 = vst [vmem:[%s1974_s11 + $0x18] sm:$0xff] %v2619_v20  ;;  %1370 = vst [vmem:[%s1974_s11 + $0x38] sm:$0xff] %v2621_v57  ;;  %p1767_p6 = pnand %p1766_p5, %p1760_p1 }
 0x132   : > { %1585 = vmatpush1.msk.msra.mxu0 %vm1251_vm8, %v1212_v26  ;;  %1613 = vmatpush1.msk.msra.mxu1 %vm1251_vm8, %v1212_v26 }
 0x133   : > { %1586 = vmatmul.mubr.msk.f32.vlgmr.msra.gmra.mrb[0].mxu0 %vm1238_vm9, %v1200_v18  ;;  %1588 = vmatmul.mubr.msk.f32.vlgmr.msra.gmra.mrb[0].mxu1 %vm1238_vm9, %v1202_v41 }
 0x134   : > { %1328 = vmatprep.mubr.f32.mxu0 %v1875_v27  ;;  %1340 = vmatprep.mubr.f32.mxu1 %v1875_v27 }
 0x137   : > { %1587 = vmatmul.mubr.msk.f32.gmra.mrb[2].mxu0 %vm1238_vm9, %v1201_v55  ;;  %1589 = vmatmul.mubr.msk.f32.gmra.mrb[2].mxu1 %vm1238_vm9, %v1203_v12 }
 0x138   : > { %1770 = shalt.err (!%p1767_p6)
}
 0x139   : > { %s1771_s11 = scalar_lea.hbm %s2633_s26, 1024  ;;  %s1775_s14 = scalar_lea.hbm %s2744_s4, 2048 }
 0x13a   : > { %p1772_p7 = scmp.ne.s32.totalorder %s2633_s26, %s1771_s11  ;;  %p1776_p11 = scmp.lt.u32.totalorder %s2633_s26, %s2744_s4 }
 0x13b   : > { %p1777_p12 = scmp.lt.u32.totalorder %s1775_s14, %s1771_s11  ;;  %p1779_p0 = scmp.lt.u32.totalorder %s1771_s11, %s2633_s26 }
 0x13c   : > { %p1773_p9 = pnand %p1772_p7, %p1946_p4 }
 0x13d   : > { %p1778_p13 = por %p1777_p12, %p1776_p11 }
 0x13e   : > { %p1774_p10 = pneg %p1773_p9 }
 0x13f   : > { %p1780_p1 = por %p1779_p0, %p1778_p13 }
 0x141   : > { %p1781_p2 = pnand %p1780_p1, %p1774_p10 }
 0x143   : > { %1784 = shalt.err (!%p1781_p2)
}
 0x144   : > { %s1878_s6 = smov 256   ;;  %s1879_s7 = smov 16  }
 0x145   : > { %1648 = dma.vmem_to_hbm [thread:$0]  (%p1946_p4), %s2636_s30, 1024, %s2633_s26, %s1393_s5, %s1878_s6, %s1878_s6, %s1879_s7  }
 0x146   : > { %s1408_s26 = sshll.u32 %s1972_s10, 4  ;;  %s2683_s8 = scalar_lea.hbm %s2743_s3, %s1598_s21  ;;  %s2685_s26 = int_to_ptr.vmem [resolvable:$true] %s1408_s26 }
 0x147   : > { %s1388_s9 = scalar_lea.sflag [#allocation4], %s1962_s29  ;;  %s1785_s11 = scalar_lea.vmem %s2685_s26, 1024 }
 0x148   : > { %p1786_p3 = scmp.ne.s32.totalorder %s2685_s26, %s1785_s11  ;;  %s1880_s18 = smov [#allocation3]  }
 0x149   : > { %s1789_s12 = sshll.u32 %s1880_s18, 4  ;;  %s1790_s12 = int_to_ptr.vmem [resolvable:$false] %s1789_s12 }
 0x14a   : > { %p1787_p5 = pnand %p1786_p3, %p1946_p4  ;;  %s1791_s21 = scalar_lea.vmem %s1790_s12, 2048 }
 0x14b   : > { %p1792_p7 = scmp.lt.s32.totalorder %s2685_s26, %s1790_s12  ;;  %p1793_p9 = scmp.lt.s32.totalorder %s1791_s21, %s1785_s11 }
 0x14c   : > { %p1788_p6 = pneg %p1787_p5 }
 0x14d   : > { %p1794_p10 = por %p1793_p9, %p1792_p7 }
 0x14f   : > { %p1795_p11 = pnand %p1794_p10, %p1788_p6 }
 0x1ab   : > { %v1231_v29 = vpop.permute.xlu1 %1230  ;;  %v1221_v59 = vpop.permute.xlu0 %1220 }
 0x1af   : > { %v1236_v24 = vpop.permute.xlu1 %1235  ;;  %v1226_v25 = vpop.permute.xlu0 %1225 }
 0x206   : > { %v1324_v16 = vpop.f32.mrb[0].mxu0  ;;  %v1336_v47 = vpop.f32.mrb[0].mxu1 }
 0x207   : > { %v1325_v30 = vadd.f32 %v1324_v16, %v1221_v59  ;;  %v1337_v48 = vadd.f32 %v1336_v47, %v1231_v29  ;;  %v1326_v10 = vpop.f32.mrb[1].mxu0  ;;  %v1338_v1 = vpop.f32.mrb[1].mxu1 }
 0x208   : > { %v1327_v36 = vadd.f32 %v1326_v10, %v1221_v59  ;;  %v1339_v5 = vadd.f32 %v1338_v1, %v1231_v29 }
 0x209   : > { %v1347_v32 = vmax.f32 %v1325_v30, 0.0  ;;  %v1351_v17 = vmax.f32 %v1337_v48, 0.0 }
 0x20a   : > { %v1348_v61 = vmax.f32 %v1327_v36, 0.0  ;;  %v1352_v28 = vmax.f32 %v1339_v5, 0.0  ;;  %v1330_v38 = vpop.f32.mrb[2].mxu0  ;;  %v1342_v6 = vpop.f32.mrb[2].mxu1 }
 0x20b   : > { %v1371_v45 = vadd.f32 %v2595_v19, %v1347_v32  ;;  %v1375_v43 = vadd.f32 %v2599_v31, %v1351_v17  ;;  %v1331_v49 = vadd.f32 %v1330_v38, %v1226_v25  ;;  %v1343_v8 = vadd.f32 %v1342_v6, %v1236_v24  ;;  %v1332_v46 = vpop.f32.mrb[3].mxu0  ;;  %v1344_v9 = vpop.f32.mrb[3].mxu1 }
 0x20c   : > { %v1372_v15 = vadd.f32 %v2603_v14, %v1348_v61  ;;  %v1376_v63 = vadd.f32 %v2605_v39, %v1352_v28  ;;  %v1333_v50 = vadd.f32 %v1332_v46, %v1226_v25  ;;  %v1345_v34 = vadd.f32 %v1344_v9, %v1236_v24 }
 0x20d   : > { %1379 = vst [vmem:[%s1972_s10] sm:$0xff] %v1371_v45  ;;  %1383 = vst [vmem:[%s1972_s10 + $0x20] sm:$0xff] %v1375_v43  ;;  %v1349_v4 = vmax.f32 %v1331_v49, 0.0  ;;  %v1353_v54 = vmax.f32 %v1343_v8, 0.0 }
 0x20e   : > { %1380 = vst [vmem:[%s1972_s10 + $0x8] sm:$0xff] %v1372_v15  ;;  %1384 = vst [vmem:[%s1972_s10 + $0x28] sm:$0xff] %v1376_v63  ;;  %v1350_v2 = vmax.f32 %v1333_v50, 0.0  ;;  %v1354_v53 = vmax.f32 %v1345_v34, 0.0 }
 0x20f   : > { %v1373_v40 = vadd.f32 %v2611_v58, %v1349_v4  ;;  %v1377_v52 = vadd.f32 %v2613_v42, %v1353_v54 }
 0x210   : > { %v1374_v11 = vadd.f32 %v2619_v20, %v1350_v2  ;;  %v1378_v62 = vadd.f32 %v2621_v57, %v1354_v53 }
 0x211   : > { %1381 = vst [vmem:[%s1972_s10 + $0x10] sm:$0xff] %v1373_v40  ;;  %1385 = vst [vmem:[%s1972_s10 + $0x30] sm:$0xff] %v1377_v52 }
 0x212   : > { %1382 = vst [vmem:[%s1972_s10 + $0x18] sm:$0xff] %v1374_v11  ;;  %1386 = vst [vmem:[%s1972_s10 + $0x38] sm:$0xff] %v1378_v62 }
 0x213   : > { %1798 = shalt.err (!%p1795_p11)
}
 0x214   : > { %s1799_s10 = scalar_lea.hbm %s2683_s8, 1024  ;;  %s1803_s22 = scalar_lea.hbm %s2743_s3, 2048 }
 0x215   : > { %p1800_p12 = scmp.ne.s32.totalorder %s2683_s8, %s1799_s10  ;;  %p1804_p1 = scmp.lt.u32.totalorder %s2683_s8, %s2743_s3 }
 0x216   : > { %p1805_p2 = scmp.lt.u32.totalorder %s1803_s22, %s1799_s10  ;;  %p1807_p5 = scmp.lt.u32.totalorder %s1799_s10, %s2683_s8 }
 0x217   : > { %p1801_p13 = pnand %p1800_p12, %p1946_p4 }
 0x218   : > { %p1806_p3 = por %p1805_p2, %p1804_p1 }
 0x219   : > { %p1802_p0 = pneg %p1801_p13 }
 0x21a   : > { %p1808_p6 = por %p1807_p5, %p1806_p3 }
 0x21c   : > { %p1809_p7 = pnand %p1808_p6, %p1802_p0 }
 0x21e   : > { %1812 = shalt.err (!%p1809_p7)
}
 0x21f   : > { %1647 = dma.vmem_to_hbm [thread:$0]  (%p1946_p4), %s2685_s26, 1024, %s2683_s8, %s1388_s9, %s1878_s6, %s1878_s6, %s1879_s7  }
 0x220 PF: > { %p1658_p9 = scmp.ge.s32.totalorder %s1867_s20, 2  ;;  %s1441_s5 = sand.u32 1, %s1847_s15  }
 0x221   : > { %s1442_s11 = scalar_lea.sflag [#allocation4], %s1441_s5 }
 0x222   : > { %p1652_p10 = pnand %p1658_p9, %p1953_p8 }
 0x224   : > { %1838 = dma.done.wait (!%p1652_p10), %s1442_s11, 1024  }
 0x225   : > { %1840 = vsyncadd (!%p1652_p10), %s1442_s11, 4294966272  ;;  %s1451_s25 = scalar_lea.sflag [#allocation6], %s1441_s5 }
 0x226   : > { %1842 = dma.done.wait (!%p1652_p10), %s1451_s25, 1024  }
 0x227   : > { %1844 = vsyncadd (!%p1652_p10), %s1451_s25, 4294966272  ;;  %s21_s20 = sadd.s32 1, %s1867_s20   ;;  %s2759_s15 = smov %s1851_s16 }
 0x228   : > { %p18_p11 = scmp.ge.s32.totalorder %s21_s20, 4   ;;  %s2760_s16 = smov %s1855_s17 }
 0x229   : > { %s2761_s17 = smov %s1959_s28  ;;  %s2762_s18 = smov %s1863_s19 }
 0x22a   : > { %s2763_s19 = smov %s2765_s23  ;;  %20 = sbr.rel (!%p18_p11) target bundleno = 6 (0x6), region = 88 }
 0x231   :  { %1456 = vsyncpa [#allocation4], 1 }
 0x232   :  { %1458 = vsyncpa [#allocation4 + $0x1], 1 }
 0x233   :  { %1459 = vsyncpa [#allocation6], 1 }
 0x234   :  { %1461 = vsyncpa [#allocation6 + $0x1], 1 }

</bundles_post_ra>
